<compile_context>
chip_gen: v5e
topology: v5e:2x2
jax: 0.10.0
libtpu: 0.0.40
codegen_flags: <defaults>
</compile_context>

<pallas_src>
import jax
import jax.numpy as jnp
from jax.experimental import pallas as pl
from jax.experimental.pallas import tpu as pltpu

Z_DIM = 100
Z_PAD = 128          # lane-dense / MXU-aligned K for the first matmul
H1 = 256
H2 = 512
OUT = 28 * 28        # 784 = 6*128 + 16  (not lane-dense)
OUT_PAD = 896        # 7*128 lane-dense output slab; sliced back to 784 in the wrapper
TB_MAX = 256         # max batch tile: fills the MXU M dimension


def _round_up(n, m):
    return (n + m - 1) // m * m


def generator_kernel(x_ref, w1_ref, b1_ref, w2_ref, b2_ref, w3_ref, b3_ref, o_ref):
    # x_ref: (tb, 128) f32 batch tile (zero-padded cols/rows); cast to bf16 in-kernel.
    # Weights bf16, biases f32, f32 MXU accumulation, bf16 output slab.
    x = x_ref[...].astype(jnp.bfloat16)

    h1 = jnp.dot(x, w1_ref[...], preferred_element_type=jnp.float32) + b1_ref[...]
    h1 = jnp.maximum(h1, 0.0).astype(jnp.bfloat16)            # ReLU

    h2 = jnp.dot(h1, w2_ref[...], preferred_element_type=jnp.float32) + b2_ref[...]
    h2 = jnp.maximum(h2, 0.0).astype(jnp.bfloat16)            # ReLU

    out = jnp.dot(h2, w3_ref[...], preferred_element_type=jnp.float32) + b3_ref[...]
    o_ref[...] = jnp.tanh(out).astype(jnp.bfloat16)           # Tanh, bf16 store


def prepare_params(params):
    """One-time (per-training-step at most) weight preparation.

    Casts weights to bf16, zero-pads w1's input dim 100->128 and the last layer
    784->896 so all kernel operands are lane-dense.  Do NOT call this inside the
    per-forward hot path.
    """
    w1, b1, w2, b2, w3, b3 = params
    w1p = jnp.pad(w1, ((0, Z_PAD - Z_DIM), (0, 0))).astype(jnp.bfloat16)   # (128, 256)
    w2p = w2.astype(jnp.bfloat16)                                          # (256, 512)
    w3p = jnp.pad(w3, ((0, 0), (0, OUT_PAD - OUT))).astype(jnp.bfloat16)   # (512, 896)
    b3p = jnp.pad(b3, ((0, 0), (0, OUT_PAD - OUT)))                        # (1, 896) f32
    return (w1p, b1, w2p, b2, w3p, b3p)


@jax.jit
def generator_forward(x, prepared_params):
    """x: (B, 100) float32.  prepared_params from `prepare_params`.
    Returns (B, 28, 28, 1) float32 (matches the torch module)."""
    w1p, b1, w2p, b2, w3p, b3p = prepared_params
    B = x.shape[0]

    # Batch tile selection:
    #  * pad B up to a multiple of 16 (bf16 sublane packing),
    #  * if the padded batch fits in one 256-row tile, split it into TWO tiles so
    #    the "parallel" batch axis can shard across v7x's two TensorCores,
    #  * otherwise tile by 256 so the MXU M dimension stays full.
    pb = _round_up(B, 16)
    if pb <= TB_MAX:
        tb = _round_up(max(pb // 2, 16), 16) if pb >= 32 else pb
    else:
        tb = TB_MAX
    pb = _round_up(pb, tb)

    # Single pad op: batch rows to pb, z columns 100->128.  Stays f32; the bf16
    # cast happens inside the kernel.
    x_p = jnp.pad(x, ((0, pb - B), (0, Z_PAD - Z_DIM)))

    flat = pl.pallas_call(
        generator_kernel,
        out_shape=jax.ShapeDtypeStruct((pb, OUT_PAD), jnp.bfloat16),
        grid_spec=pltpu.PrefetchScalarGridSpec(
            num_scalar_prefetch=0,
            grid=(pb // tb,),
            in_specs=[
                pl.BlockSpec((tb, Z_PAD), lambda i: (i, 0)),       # x tile (f32)
                pl.BlockSpec((Z_PAD, H1), lambda i: (0, 0)),       # w1 (bf16, resident)
                pl.BlockSpec((1, H1), lambda i: (0, 0)),           # b1
                pl.BlockSpec((H1, H2), lambda i: (0, 0)),          # w2 (bf16, resident)
                pl.BlockSpec((1, H2), lambda i: (0, 0)),           # b2
                pl.BlockSpec((H2, OUT_PAD), lambda i: (0, 0)),     # w3 (padded, resident)
                pl.BlockSpec((1, OUT_PAD), lambda i: (0, 0)),      # b3 (padded)
            ],
            out_specs=pl.BlockSpec((tb, OUT_PAD), lambda i: (i, 0)),
        ),
        compiler_params=pltpu.CompilerParams(
            dimension_semantics=("parallel",),     # megacore shards the batch axis on v7x
            vmem_limit_bytes=32 * 1024 * 1024,     # explicit; actual use is only a few MB
        ),
    )(x_p, w1p, b1, w2p, b2, w3p, b3p)

    # Drop padding, restore f32, match PyTorch: img.view(-1, 28, 28, 1)
    return flat[:B, :OUT].astype(jnp.float32).reshape(-1, 28, 28, 1)


def init_params(key):
    """Deterministic init mimicking nn.Linear default: U(-1/sqrt(fan_in), 1/sqrt(fan_in))."""
    ks = jax.random.split(key, 6)

    def lin(kw, kb, fan_in, fan_out):
        bound = 1.0 / jnp.sqrt(jnp.float32(fan_in))
        w = jax.random.uniform(kw, (fan_in, fan_out), jnp.float32, -bound, bound)
        b = jax.random.uniform(kb, (1, fan_out), jnp.float32, -bound, bound)
        return w, b

    w1, b1 = lin(ks[0], ks[1], Z_DIM, H1)
    w2, b2 = lin(ks[2], ks[3], H1, H2)
    w3, b3 = lin(ks[4], ks[5], H2, OUT)
    return (w1, b1, w2, b2, w3, b3)


def reference_forward(x, params):
    """Pure-JAX f32 reference of the original torch module."""
    w1, b1, w2, b2, w3, b3 = params
    h1 = jnp.maximum(x @ w1 + b1, 0.0)
    h2 = jnp.maximum(h1 @ w2 + b2, 0.0)
    return jnp.tanh(h2 @ w3 + b3).reshape(-1, 28, 28, 1)


if __name__ == "__main__":
    key = jax.random.PRNGKey(0)
    k_param, k_x1, k_x2 = jax.random.split(key, 3)
    params = init_params(k_param)
    prepped = jax.block_until_ready(prepare_params(params))   # hoisted, one-time

    # Small batch: pb=16 -> single grid step.
    x = jax.random.normal(k_x1, (8, Z_DIM), jnp.float32)
    img = jax.block_until_ready(generator_forward(x, prepped))
    assert img.shape == (8, 28, 28, 1), img.shape
    ref = reference_forward(x, params)
    err = float(jnp.max(jnp.abs(img - ref)))
    assert err < 3e-2, err

    # Batch not a multiple of 16: exercises pad/slice and the 2-step grid path.
    x2 = jax.random.normal(k_x2, (20, Z_DIM), jnp.float32)
    img2 = jax.block_until_ready(generator_forward(x2, prepped))
    assert img2.shape == (20, 28, 28, 1), img2.shape
    ref2 = reference_forward(x2, params)
    err2 = float(jnp.max(jnp.abs(img2 - ref2)))
    assert err2 < 3e-2, err2

    print("KERNEL_OK")
</pallas_src>

<mosaic_0001>
module attributes {stable_mosaic.version = 11 : i64} {
  func.func @generator_kernel(%arg0: i32, %arg1: memref<16x128xf32, #tpu.memory_space<vmem>>, %arg2: memref<128x256xbf16, #tpu.memory_space<vmem>>, %arg3: memref<1x256xf32, #tpu.memory_space<vmem>>, %arg4: memref<256x512xbf16, #tpu.memory_space<vmem>>, %arg5: memref<1x512xf32, #tpu.memory_space<vmem>>, %arg6: memref<512x896xbf16, #tpu.memory_space<vmem>>, %arg7: memref<1x896xf32, #tpu.memory_space<vmem>>, %arg8: memref<16x896xbf16, #tpu.memory_space<vmem>>) attributes {dimension_semantics = [#tpu.dimension_semantics<parallel>], iteration_bounds = array<i64: 1>, scalar_prefetch = 0 : i64, scratch_operands = 0 : i64, tpu.core_type = #tpu.core_type<tc>, window_params = [{transform_indices = @transform_0, window_bounds = array<i64: 16, 128>}, {pipeline_mode = #tpu.pipeline_mode<synchronous>, transform_indices = @transform_1, window_bounds = array<i64: 128, 256>}, {pipeline_mode = #tpu.pipeline_mode<synchronous>, transform_indices = @transform_2, window_bounds = array<i64: 1, 256>}, {pipeline_mode = #tpu.pipeline_mode<synchronous>, transform_indices = @transform_3, window_bounds = array<i64: 256, 512>}, {pipeline_mode = #tpu.pipeline_mode<synchronous>, transform_indices = @transform_4, window_bounds = array<i64: 1, 512>}, {pipeline_mode = #tpu.pipeline_mode<synchronous>, transform_indices = @transform_5, window_bounds = array<i64: 512, 896>}, {pipeline_mode = #tpu.pipeline_mode<synchronous>, transform_indices = @transform_6, window_bounds = array<i64: 1, 896>}, {transform_indices = @transform_7, window_bounds = array<i64: 16, 896>}]} {
    %c0 = arith.constant 0 : index
    %c0_0 = arith.constant 0 : index
    %0 = vector.load %arg1[%c0, %c0_0] : memref<16x128xf32, #tpu.memory_space<vmem>>, vector<16x128xf32>
    %1 = arith.truncf %0 : vector<16x128xf32> to vector<16x128xbf16>
    %c0_1 = arith.constant 0 : index
    %c0_2 = arith.constant 0 : index
    %2 = vector.load %arg2[%c0_1, %c0_2] : memref<128x256xbf16, #tpu.memory_space<vmem>>, vector<128x256xbf16>
    %cst = arith.constant dense<0.000000e+00> : vector<16x256xf32>
    %3 = tpu.matmul %1, %2, %cst {dimension_numbers = #tpu.dot_dimension_numbers<[1], [0], [0], [1], [0, 0, 1, 1], [], []>} : vector<16x128xbf16>, vector<128x256xbf16>, vector<16x256xf32> -> vector<16x256xf32>
    %c0_3 = arith.constant 0 : index
    %c0_4 = arith.constant 0 : index
    %4 = vector.load %arg3[%c0_3, %c0_4] : memref<1x256xf32, #tpu.memory_space<vmem>>, vector<1x256xf32>
    %5 = vector.broadcast %4 : vector<1x256xf32> to vector<16x256xf32>
    %6 = arith.addf %3, %5 : vector<16x256xf32>
    %cst_5 = arith.constant 0.000000e+00 : f32
    %7 = vector.broadcast %cst_5 : f32 to vector<16x256xf32>
    %8 = arith.maximumf %6, %7 : vector<16x256xf32>
    %9 = arith.truncf %8 : vector<16x256xf32> to vector<16x256xbf16>
    %c0_6 = arith.constant 0 : index
    %c0_7 = arith.constant 0 : index
    %10 = vector.load %arg4[%c0_6, %c0_7] : memref<256x512xbf16, #tpu.memory_space<vmem>>, vector<256x512xbf16>
    %cst_8 = arith.constant dense<0.000000e+00> : vector<16x512xf32>
    %11 = tpu.matmul %9, %10, %cst_8 {dimension_numbers = #tpu.dot_dimension_numbers<[1], [0], [0], [1], [0, 0, 1, 1], [], []>} : vector<16x256xbf16>, vector<256x512xbf16>, vector<16x512xf32> -> vector<16x512xf32>
    %c0_9 = arith.constant 0 : index
    %c0_10 = arith.constant 0 : index
    %12 = vector.load %arg5[%c0_9, %c0_10] : memref<1x512xf32, #tpu.memory_space<vmem>>, vector<1x512xf32>
    %13 = vector.broadcast %12 : vector<1x512xf32> to vector<16x512xf32>
    %14 = arith.addf %11, %13 : vector<16x512xf32>
    %cst_11 = arith.constant 0.000000e+00 : f32
    %15 = vector.broadcast %cst_11 : f32 to vector<16x512xf32>
    %16 = arith.maximumf %14, %15 : vector<16x512xf32>
    %17 = arith.truncf %16 : vector<16x512xf32> to vector<16x512xbf16>
    %c0_12 = arith.constant 0 : index
    %c0_13 = arith.constant 0 : index
    %18 = vector.load %arg6[%c0_12, %c0_13] : memref<512x896xbf16, #tpu.memory_space<vmem>>, vector<512x896xbf16>
    %cst_14 = arith.constant dense<0.000000e+00> : vector<16x896xf32>
    %19 = tpu.matmul %17, %18, %cst_14 {dimension_numbers = #tpu.dot_dimension_numbers<[1], [0], [0], [1], [0, 0, 1, 1], [], []>} : vector<16x512xbf16>, vector<512x896xbf16>, vector<16x896xf32> -> vector<16x896xf32>
    %c0_15 = arith.constant 0 : index
    %c0_16 = arith.constant 0 : index
    %20 = vector.load %arg7[%c0_15, %c0_16] : memref<1x896xf32, #tpu.memory_space<vmem>>, vector<1x896xf32>
    %21 = vector.broadcast %20 : vector<1x896xf32> to vector<16x896xf32>
    %22 = arith.addf %19, %21 : vector<16x896xf32>
    %23 = math.tanh %22 : vector<16x896xf32>
    %24 = arith.truncf %23 : vector<16x896xf32> to vector<16x896xbf16>
    %c0_17 = arith.constant 0 : index
    %c0_18 = arith.constant 0 : index
    %25 = vector.load %arg8[%c0_17, %c0_18] : memref<16x896xbf16, #tpu.memory_space<vmem>>, vector<16x896xbf16>
    tpu.vector_store %arg8[%c0_17, %c0_18], %24 {strides = array<i32>} : memref<16x896xbf16, #tpu.memory_space<vmem>>, vector<16x896xbf16>,
    return
  }
  func.func @transform_0(%arg0: i32) -> (i32, i32) {
    %c0_i32 = arith.constant 0 : i32
    %c0_i32_0 = arith.constant 0 : i32
    return %arg0, %c0_i32 : i32, i32
  }
  func.func @transform_1(%arg0: i32) -> (i32, i32) {
    %c0_i32 = arith.constant 0 : i32
    %c0_i32_0 = arith.constant 0 : i32
    %c0_i32_1 = arith.constant 0 : i32
    return %c0_i32, %c0_i32_0 : i32, i32
  }
  func.func @transform_2(%arg0: i32) -> (i32, i32) {
    %c0_i32 = arith.constant 0 : i32
    %c0_i32_0 = arith.constant 0 : i32
    %c0_i32_1 = arith.constant 0 : i32
    return %c0_i32, %c0_i32_0 : i32, i32
  }
  func.func @transform_3(%arg0: i32) -> (i32, i32) {
    %c0_i32 = arith.constant 0 : i32
    %c0_i32_0 = arith.constant 0 : i32
    %c0_i32_1 = arith.constant 0 : i32
    return %c0_i32, %c0_i32_0 : i32, i32
  }
  func.func @transform_4(%arg0: i32) -> (i32, i32) {
    %c0_i32 = arith.constant 0 : i32
    %c0_i32_0 = arith.constant 0 : i32
    %c0_i32_1 = arith.constant 0 : i32
    return %c0_i32, %c0_i32_0 : i32, i32
  }
  func.func @transform_5(%arg0: i32) -> (i32, i32) {
    %c0_i32 = arith.constant 0 : i32
    %c0_i32_0 = arith.constant 0 : i32
    %c0_i32_1 = arith.constant 0 : i32
    return %c0_i32, %c0_i32_0 : i32, i32
  }
  func.func @transform_6(%arg0: i32) -> (i32, i32) {
    %c0_i32 = arith.constant 0 : i32
    %c0_i32_0 = arith.constant 0 : i32
    %c0_i32_1 = arith.constant 0 : i32
    return %c0_i32, %c0_i32_0 : i32, i32
  }
  func.func @transform_7(%arg0: i32) -> (i32, i32) {
    %c0_i32 = arith.constant 0 : i32
    %c0_i32_0 = arith.constant 0 : i32
    return %arg0, %c0_i32 : i32, i32
  }
}

</mosaic_0001>

<bundles_post_ra>
// kernel: generator_forward.1
= control target key start
LH: loop header
LB: loop body
LE: loop exit
PB: predicated region body
PF: predicated region fallthrough
CT: control target
= control target key end

     0   :  { %12 = vsyncpa [#allocation3], 0  ;;  %s4381_s0 = inlined_call_operand.vmem [shape: f32[16,128], index: 0, kind: input, shape index: {}]   ;;  %s4382_s1 = inlined_call_operand.hbm [shape: bf16[128,256], index: 1, kind: input, shape index: {}]   ;;  %s4383_s2 = inlined_call_operand.vmem [shape: f32[1,256], index: 2, kind: input, shape index: {}]   ;;  %s4384_s3 = inlined_call_operand.hbm [shape: bf16[256,512], index: 3, kind: input, shape index: {}]   ;;  %s4385_s4 = inlined_call_operand.vmem [shape: f32[1,512], index: 4, kind: input, shape index: {}]   ;;  %s4386_s5 = inlined_call_operand.hbm [shape: bf16[512,896], index: 5, kind: input, shape index: {}]   ;;  %s4387_s6 = inlined_call_operand.vmem [shape: f32[1,896], index: 6, kind: input, shape index: {}]   ;;  %s4388_s7 = inlined_call_operand.vmem [shape: bf16[16,896], index: 7, kind: output, shape index: {}]  }
   0x1   :  { %13 = vsyncpa [#allocation5], 0  ;;  %s35_s26 = sshll.u32 %s4384_s3, 4  ;;  %s4215_s27 = smov [#allocation4]   ;;  %s36_s26 = int_to_ptr.hbm [resolvable:$true] %s35_s26 }
   0x2   :  { %s37_s28 = sshll.u32 %s4215_s27, 4  ;;  %s20_s8 = sshll.u32 %s4382_s1, 4  ;;  %s38_s28 = int_to_ptr.vmem [resolvable:$true] %s37_s28  ;;  %s21_s8 = int_to_ptr.hbm [resolvable:$true] %s20_s8 }
   0x3   :  { %s4216_s9 = smov 256   ;;  %s4217_s10 = smov 16  }
   0x4   :  { %43 = dma.hbm_to_vmem [thread:$0]  %s36_s26, 8192, %s38_s28, [#allocation5], %s4216_s9, %s4216_s9, %s4217_s10  }
   0x5   :  { %s4218_s11 = smov [#allocation2]   ;;  %s4219_s13 = smov 128  }
   0x6   :  { %s22_s12 = sshll.u32 %s4218_s11, 4  ;;  %s4220_s14 = smov 8   ;;  %s23_s12 = int_to_ptr.vmem [resolvable:$true] %s22_s12 }
   0x7   :  { %28 = dma.hbm_to_vmem [thread:$0]  %s21_s8, 2048, %s23_s12, [#allocation3], %s4219_s13, %s4219_s13, %s4220_s14  }
   0x8   :  { %s50_s16 = sshll.u32 %s4386_s5, 4  ;;  %s4221_s17 = smov [#allocation6]   ;;  %s51_s16 = int_to_ptr.hbm [resolvable:$true] %s50_s16 }
   0x9   :  { %s52_s18 = sshll.u32 %s4221_s17, 4  ;;  %s4222_s19 = smov 448   ;;  %s53_s18 = int_to_ptr.vmem [resolvable:$true] %s52_s18 }
   0xa   :  { %s4223_s1 = smov 28  }
   0xb   :  { %58 = dma.hbm_to_vmem [thread:$0]  %s51_s16, 28672, %s53_s18, [#allocation5], %s4222_s19, %s4222_s19, %s4223_s1  }
   0xc   :  { %4211 = dma.done.wait [#allocation3], 2048  }
   0xd   :  { %4212 = vsyncadd [#allocation3], 4294965248 }
   0xe   :  { %4213 = dma.done.wait [#allocation5], 36864  }
   0xf   :  { %4214 = vsyncadd [#allocation5], 4294930432  ;;  %v2640_v0 = vld [vmem:[#allocation2 + $0x70] sm:$0xf]  ;;  %v3813_v1 = vld [vmem:[#allocation2 + $0x74] sm:$0xf0] }
  0x10   :  { %v3812_v2 = vld [vmem:[#allocation2 + $0x74] sm:$0xf]  ;;  %v2641_v3 = vor.u32 %v3813_v1, %v2640_v0  ;;  %v2642_v4 = vld [vmem:[#allocation2 + $0x78] sm:$0xf0]  ;;  %v2632_v5 = vld [vmem:[#allocation2 + $0x60] sm:$0xf] }
  0x11   :  { %v3811_v6 = vld [vmem:[#allocation2 + $0x64] sm:$0xf0]  ;;  %v2645_v7 = vor.u32 %v3812_v2, %v2642_v4  ;;  %v3810_v8 = vld [vmem:[#allocation2 + $0x64] sm:$0xf]  ;;  %v2634_v9 = vld [vmem:[#allocation2 + $0x68] sm:$0xf0] }
  0x12   :  { %178 = vmatpush.bf16.msra.mxu0 %v2641_v3  ;;  %v2633_v10 = vor.u32 %v3811_v6, %v2632_v5  ;;  %v2637_v11 = vor.u32 %v3810_v8, %v2634_v9  ;;  %v2624_v12 = vld [vmem:[#allocation2 + $0x50] sm:$0xf]  ;;  %v3809_v13 = vld [vmem:[#allocation2 + $0x54] sm:$0xf0]  ;;  %v3808_v14 = vld [vmem:[#allocation2 + $0x54] sm:$0xf] }
  0x13   :  { %192 = vmatpush.bf16.msra.mxu1 %v2645_v7  ;;  %v2626_v15 = vld [vmem:[#allocation2 + $0x58] sm:$0xf0]  ;;  %v2625_v16 = vor.u32 %v3809_v13, %v2624_v12  ;;  %v2616_v18 = vld [vmem:[#allocation2 + $0x40] sm:$0xf]  ;;  %v3807_v19 = vld [vmem:[#allocation2 + $0x44] sm:$0xf0] }
  0x14   :  { %v2629_v17 = vor.u32 %v3808_v14, %v2626_v15  ;;  %v3806_v20 = vld [vmem:[#allocation2 + $0x44] sm:$0xf]  ;;  %v2618_v21 = vld [vmem:[#allocation2 + $0x48] sm:$0xf0]  ;;  %v2617_v22 = vor.u32 %v3807_v19, %v2616_v18  ;;  %v2608_v23 = vld [vmem:[#allocation2 + $0x30] sm:$0xf] }
  0x15   :  { %v2760_v24 = vld [vmem:[#allocation4 + $0xe0] sm:$0xf]  ;;  %v3844_v25 = vld [vmem:[#allocation4 + $0xec] sm:$0xf0]  ;;  %v2621_v26 = vor.u32 %v3806_v20, %v2618_v21  ;;  %v3805_v27 = vld [vmem:[#allocation2 + $0x34] sm:$0xf0] }
  0x16   :  { %179 = vmatpush.bf16.msra.mxu0 %v2633_v10  ;;  %v2761_v28 = vor.u32 %v3844_v25, %v2760_v24  ;;  %v2888_v29 = vld [vmem:[#allocation4 + $0x1e0] sm:$0xf]  ;;  %v3876_v30 = vld [vmem:[#allocation4 + $0x1ec] sm:$0xf0]  ;;  %v3804_v31 = vld [vmem:[#allocation2 + $0x34] sm:$0xf]  ;;  %v2609_v37 = vor.u32 %v3805_v27, %v2608_v23 }
  0x17   :  { %193 = vmatpush.bf16.msra.mxu1 %v2637_v11  ;;  %v2610_v32 = vld [vmem:[#allocation2 + $0x38] sm:$0xf0]  ;;  %v2889_v33 = vor.u32 %v3876_v30, %v2888_v29  ;;  %v2744_v34 = vld [vmem:[#allocation4 + $0xc0] sm:$0xf]  ;;  %v3840_v35 = vld [vmem:[#allocation4 + $0xcc] sm:$0xf0] }
  0x18   :  { %606 = vmatpush.bf16.msra.mxu2 %v2761_v28  ;;  %v2872_v36 = vld [vmem:[#allocation4 + $0x1c0] sm:$0xf]  ;;  %v3803_v39 = vld [vmem:[#allocation2 + $0x24] sm:$0xf0]  ;;  %v2745_v40 = vor.u32 %v3840_v35, %v2744_v34  ;;  %v3872_v41 = vld [vmem:[#allocation4 + $0x1cc] sm:$0xf0]  ;;  %v2613_v42 = vor.u32 %v3804_v31, %v2610_v32 }
  0x19   :  { %v2600_v38 = vld [vmem:[#allocation2 + $0x20] sm:$0xf]  ;;  %620 = vmatpush.bf16.msra.mxu3 %v2889_v33  ;;  %v3802_v43 = vld [vmem:[#allocation2 + $0x24] sm:$0xf]  ;;  %v2602_v44 = vld [vmem:[#allocation2 + $0x28] sm:$0xf0]  ;;  %v2873_v45 = vor.u32 %v3872_v41, %v2872_v36 }
  0x1a   :  { %180 = vmatpush.bf16.msra.mxu0 %v2625_v16  ;;  %v2728_v46 = vld [vmem:[#allocation4 + $0xa0] sm:$0xf]  ;;  %v3836_v47 = vld [vmem:[#allocation4 + $0xac] sm:$0xf0]  ;;  %v2601_v51 = vor.u32 %v3803_v39, %v2600_v38  ;;  %v2605_v56 = vor.u32 %v3802_v43, %v2602_v44  ;;  %v3801_v57 = vld [vmem:[#allocation2 + $0x14] sm:$0xf0] }
  0x1b   :  { %194 = vmatpush.bf16.msra.mxu1 %v2629_v17  ;;  %v2856_v48 = vld [vmem:[#allocation4 + $0x1a0] sm:$0xf]  ;;  %v3868_v49 = vld [vmem:[#allocation4 + $0x1ac] sm:$0xf0]  ;;  %v2729_v50 = vor.u32 %v3836_v47, %v2728_v46  ;;  %v3800_v60 = vld [vmem:[#allocation2 + $0x14] sm:$0xf] }
  0x1c   :  { %607 = vmatpush.bf16.msra.mxu2 %v2745_v40  ;;  %v2592_v52 = vld [vmem:[#allocation2 + $0x10] sm:$0xf]  ;;  %v2857_v53 = vor.u32 %v3868_v49, %v2856_v48  ;;  %v2712_v54 = vld [vmem:[#allocation4 + $0x80] sm:$0xf]  ;;  %v2594_v61 = vld [vmem:[#allocation2 + $0x18] sm:$0xf0] }
  0x1d   :  { %621 = vmatpush.bf16.msra.mxu3 %v2873_v45  ;;  %v3832_v55 = vld [vmem:[#allocation4 + $0x8c] sm:$0xf0]  ;;  %v2840_v58 = vld [vmem:[#allocation4 + $0x180] sm:$0xf]  ;;  %v2593_v0 = vor.u32 %v3801_v57, %v2592_v52  ;;  %v3799_v1 = vld [vmem:[#allocation2 + $0x4] sm:$0xf0]  ;;  %v2597_v5 = vor.u32 %v3800_v60, %v2594_v61 }
  0x1e   :  { %181 = vmatpush.bf16.msra.mxu0 %v2617_v22  ;;  %v3864_v59 = vld [vmem:[#allocation4 + $0x18c] sm:$0xf0]  ;;  %v2584_v62 = vld [vmem:[#allocation2] sm:$0xf]  ;;  %v2713_v63 = vor.u32 %v3832_v55, %v2712_v54  ;;  %v3798_v6 = vld [vmem:[#allocation2 + $0x4] sm:$0xf] }
  0x1f   :  { %195 = vmatpush.bf16.msra.mxu1 %v2621_v26  ;;  %v2841_v2 = vor.u32 %v3864_v59, %v2840_v58  ;;  %v2696_v3 = vld [vmem:[#allocation4 + $0x60] sm:$0xf]  ;;  %v3828_v4 = vld [vmem:[#allocation4 + $0x6c] sm:$0xf0]  ;;  %v2586_v9 = vld [vmem:[#allocation2 + $0x8] sm:$0xf0]  ;;  %v2585_v16 = vor.u32 %v3799_v1, %v2584_v62 }
  0x20   :  { %608 = vmatpush.bf16.msra.mxu2 %v2729_v50  ;;  %v2824_v7 = vld [vmem:[#allocation4 + $0x160] sm:$0xf]  ;;  %v3860_v8 = vld [vmem:[#allocation4 + $0x16c] sm:$0xf0]  ;;  %v3842_v10 = vld [vmem:[#allocation4 + $0xe4] sm:$0xf]  ;;  %v2697_v15 = vor.u32 %v3828_v4, %v2696_v3  ;;  %v2589_v21 = vor.u32 %v3798_v6, %v2586_v9 }
  0x21   :  { %622 = vmatpush.bf16.msra.mxu3 %v2857_v53  ;;  %v2762_v11 = vld [vmem:[#allocation4 + $0xf0] sm:$0xf0]  ;;  %v73_v12 = vld [vmem:[%s4381_s0] sm:$0xff]  ;;  %v74_v17 = vld [vmem:[%s4381_s0 + $0x8] sm:$0xff]  ;;  %v2825_v18 = vor.u32 %v3860_v8, %v2824_v7 }
  0x22   :  { %182 = vmatpush.bf16.msra.mxu0 %v2609_v37  ;;  %v3874_v13 = vld [vmem:[#allocation4 + $0x1e4] sm:$0xf]  ;;  %v2890_v14 = vld [vmem:[#allocation4 + $0x1f0] sm:$0xf0]  ;;  %v2680_v19 = vld [vmem:[#allocation4 + $0x40] sm:$0xf]  ;;  %v2765_v22 = vor.u32 %v3842_v10, %v2762_v11  ;;  %v75_v28 = vpack.c.bf16 %v74_v17, %v73_v12 }
  0x23   :  { %196 = vmatpush.bf16.msra.mxu1 %v2613_v42  ;;  %v3824_v20 = vld [vmem:[#allocation4 + $0x4c] sm:$0xf0]  ;;  %v2808_v23 = vld [vmem:[#allocation4 + $0x140] sm:$0xf]  ;;  %v2893_v25 = vor.u32 %v3874_v13, %v2890_v14  ;;  %v3838_v26 = vld [vmem:[#allocation4 + $0xc4] sm:$0xf] }
  0x24   :  { %609 = vmatpush.bf16.msra.mxu2 %v2713_v63  ;;  %v3856_v24 = vld [vmem:[#allocation4 + $0x14c] sm:$0xf0]  ;;  %v2746_v27 = vld [vmem:[#allocation4 + $0xd0] sm:$0xf0]  ;;  %v3870_v29 = vld [vmem:[#allocation4 + $0x1c4] sm:$0xf]  ;;  %v2681_v31 = vor.u32 %v3824_v20, %v2680_v19 }
  0x25   :  { %623 = vmatpush.bf16.msra.mxu3 %v2841_v2  ;;  %v2874_v30 = vld [vmem:[#allocation4 + $0x1d0] sm:$0xf0]  ;;  %v2809_v32 = vor.u32 %v3856_v24, %v2808_v23  ;;  %v2664_v33 = vld [vmem:[#allocation4 + $0x20] sm:$0xf]  ;;  %v3820_v34 = vld [vmem:[#allocation4 + $0x2c] sm:$0xf0]  ;;  %v2749_v35 = vor.u32 %v3838_v26, %v2746_v27 }
  0x26   :  { %183 = vmatpush.bf16.msra.mxu0 %v2601_v51  ;;  %v2792_v36 = vld [vmem:[#allocation4 + $0x120] sm:$0xf]  ;;  %v3852_v37 = vld [vmem:[#allocation4 + $0x12c] sm:$0xf0]  ;;  %v2877_v38 = vor.u32 %v3870_v29, %v2874_v30  ;;  %v3834_v39 = vld [vmem:[#allocation4 + $0xa4] sm:$0xf]  ;;  %v2665_v43 = vor.u32 %v3820_v34, %v2664_v33 }
  0x27   :  { %197 = vmatpush.bf16.msra.mxu1 %v2605_v56  ;;  %v2730_v40 = vld [vmem:[#allocation4 + $0xb0] sm:$0xf0]  ;;  %v3866_v41 = vld [vmem:[#allocation4 + $0x1a4] sm:$0xf]  ;;  %v2793_v44 = vor.u32 %v3852_v37, %v2792_v36  ;;  %v2648_v45 = vld [vmem:[#allocation4] sm:$0xf] }
  0x28   :  { %610 = vmatpush.bf16.msra.mxu2 %v2697_v15  ;;  %v2858_v42 = vld [vmem:[#allocation4 + $0x1b0] sm:$0xf0]  ;;  %v3816_v46 = vld [vmem:[#allocation4 + $0xc] sm:$0xf0]  ;;  %v2733_v47 = vor.u32 %v3834_v39, %v2730_v40  ;;  %v2776_v48 = vld [vmem:[#allocation4 + $0x100] sm:$0xf] }
  0x29   :  { %624 = vmatpush.bf16.msra.mxu3 %v2825_v18  ;;  %v3848_v49 = vld [vmem:[#allocation4 + $0x10c] sm:$0xf0]  ;;  %v2861_v50 = vor.u32 %v3866_v41, %v2858_v42  ;;  %v3830_v51 = vld [vmem:[#allocation4 + $0x84] sm:$0xf]  ;;  %v2714_v52 = vld [vmem:[#allocation4 + $0x90] sm:$0xf0]  ;;  %v2649_v55 = vor.u32 %v3816_v46, %v2648_v45 }
  0x2a   :  { %184 = vmatpush.bf16.msra.mxu0 %v2593_v0  ;;  %v3862_v53 = vld [vmem:[#allocation4 + $0x184] sm:$0xf]  ;;  %v2842_v54 = vld [vmem:[#allocation4 + $0x190] sm:$0xf0]  ;;  %v2777_v56 = vor.u32 %v3848_v49, %v2776_v48  ;;  %v2717_v57 = vor.u32 %v3830_v51, %v2714_v52  ;;  %v2768_v19 = vld [vmem:[#allocation4 + $0xe8] sm:$0xf] }
  0x2b   :  { %198 = vmatpush.bf16.msra.mxu1 %v2597_v5  ;;  %v2845_v58 = vor.u32 %v3862_v53, %v2842_v54  ;;  %v3826_v59 = vld [vmem:[#allocation4 + $0x64] sm:$0xf]  ;;  %v2698_v60 = vld [vmem:[#allocation4 + $0x70] sm:$0xf0]  ;;  %v3845_v20 = vld [vmem:[#allocation4 + $0xf4] sm:$0xf0] }
  0x2c   :  { %611 = vmatpush.bf16.msra.mxu2 %v2681_v31  ;;  %v3858_v61 = vld [vmem:[#allocation4 + $0x164] sm:$0xf]  ;;  %v2826_v62 = vld [vmem:[#allocation4 + $0x170] sm:$0xf0]  ;;  %v2701_v63 = vor.u32 %v3826_v59, %v2698_v60  ;;  %v3877_v23 = vld [vmem:[#allocation4 + $0x1f4] sm:$0xf0] }
  0x2d   :  { %625 = vmatpush.bf16.msra.mxu3 %v2809_v32  ;;  %v2829_v0 = vor.u32 %v3858_v61, %v2826_v62  ;;  %v3822_v1 = vld [vmem:[#allocation4 + $0x44] sm:$0xf]  ;;  %v2682_v2 = vld [vmem:[#allocation4 + $0x50] sm:$0xf0]  ;;  %v3843_v24 = vld [vmem:[#allocation4 + $0xec] sm:$0xf] }
  0x2e   :  { %185 = vmatpush.bf16.msra.mxu0 %v2585_v16  ;;  %v3854_v3 = vld [vmem:[#allocation4 + $0x144] sm:$0xf]  ;;  %v2810_v4 = vld [vmem:[#allocation4 + $0x150] sm:$0xf0]  ;;  %v2685_v5 = vor.u32 %v3822_v1, %v2682_v2  ;;  %v2898_v29 = vld [vmem:[#allocation4 + $0x1f8] sm:$0xf0] }
  0x2f   :  { %199 = vmatpush.bf16.msra.mxu1 %v2589_v21  ;;  %v2813_v6 = vor.u32 %v3854_v3, %v2810_v4  ;;  %v3818_v7 = vld [vmem:[#allocation4 + $0x24] sm:$0xf]  ;;  %v2666_v8 = vld [vmem:[#allocation4 + $0x30] sm:$0xf0]  ;;  %v2896_v21 = vld [vmem:[#allocation4 + $0x1e8] sm:$0xf] }
  0x30   :  { %612 = vmatpush.bf16.msra.mxu2 %v2665_v43  ;;  %v3850_v9 = vld [vmem:[#allocation4 + $0x124] sm:$0xf]  ;;  %v2794_v10 = vld [vmem:[#allocation4 + $0x130] sm:$0xf0]  ;;  %v2669_v11 = vor.u32 %v3818_v7, %v2666_v8  ;;  %v2897_v26 = vor.u32 %v3877_v23, %v2896_v21  ;;  %v2752_v31 = vld [vmem:[#allocation4 + $0xc8] sm:$0xf] }
  0x31   :  { %186 = vmatmul.bf16.vlgmr.msra.gmra.mxu0 %v75_v28  ;;  %626 = vmatpush.bf16.msra.mxu3 %v2793_v44  ;;  %v2797_v12 = vor.u32 %v3850_v9, %v2794_v10  ;;  %v3814_v13 = vld [vmem:[#allocation4 + $0x4] sm:$0xf]  ;;  %v2650_v14 = vld [vmem:[#allocation4 + $0x10] sm:$0xf0]  ;;  %v3841_v32 = vld [vmem:[#allocation4 + $0xd4] sm:$0xf0] }
  0x32   :  { %634 = vmatpush.bf16.msrb.mxu0 %v2765_v22  ;;  %200 = vmatmul.bf16.vlgmr.msra.gmra.mxu1 %v75_v28  ;;  %v3846_v15 = vld [vmem:[#allocation4 + $0x104] sm:$0xf]  ;;  %v2778_v16 = vld [vmem:[#allocation4 + $0x110] sm:$0xf0]  ;;  %v2653_v17 = vor.u32 %v3814_v13, %v2650_v14  ;;  %v2769_v22 = vor.u32 %v3845_v20, %v2768_v19  ;;  %v3875_v28 = vld [vmem:[#allocation4 + $0x1ec] sm:$0xf]  ;;  %v2753_v33 = vor.u32 %v3841_v32, %v2752_v31 }
  0x33   :  { %648 = vmatpush.bf16.msrb.mxu1 %v2893_v25  ;;  %v2781_v18 = vor.u32 %v3846_v15, %v2778_v16  ;;  %v2770_v25 = vld [vmem:[#allocation4 + $0xf8] sm:$0xf0]  ;;  %v2901_v30 = vor.u32 %v3875_v28, %v2898_v29  ;;  %v2880_v34 = vld [vmem:[#allocation4 + $0x1c8] sm:$0xf]  ;;  %v3839_v36 = vld [vmem:[#allocation4 + $0xcc] sm:$0xf] }
  0x34   :  { %613 = vmatpush.bf16.msra.mxu2 %v2649_v55  ;;  %v2773_v27 = vor.u32 %v3843_v24, %v2770_v25  ;;  %v3871_v39 = vld [vmem:[#allocation4 + $0x1cc] sm:$0xf]  ;;  %v2882_v40 = vld [vmem:[#allocation4 + $0x1d8] sm:$0xf0]  ;;  %v2736_v43 = vld [vmem:[#allocation4 + $0xa8] sm:$0xf] }
  0x35   :  { %627 = vmatpush.bf16.msra.mxu3 %v2777_v56  ;;  %v2885_v42 = vor.u32 %v3871_v39, %v2882_v40  ;;  %v3837_v44 = vld [vmem:[#allocation4 + $0xb4] sm:$0xf0]  ;;  %v2864_v45 = vld [vmem:[#allocation4 + $0x1a8] sm:$0xf]  ;;  %v3835_v48 = vld [vmem:[#allocation4 + $0xac] sm:$0xf] }
  0x36   :  { %635 = vmatpush.bf16.msrb.mxu0 %v2749_v35  ;;  %v3873_v35 = vld [vmem:[#allocation4 + $0x1d4] sm:$0xf0]  ;;  %v2737_v46 = vor.u32 %v3837_v44, %v2736_v43  ;;  %v2738_v49 = vld [vmem:[#allocation4 + $0xb8] sm:$0xf0]  ;;  %v3867_v52 = vld [vmem:[#allocation4 + $0x1ac] sm:$0xf] }
  0x37   :  { %649 = vmatpush.bf16.msrb.mxu1 %v2877_v38  ;;  %v2881_v37 = vor.u32 %v3873_v35, %v2880_v34  ;;  %v2754_v38 = vld [vmem:[#allocation4 + $0xd8] sm:$0xf0]  ;;  %v2741_v51 = vor.u32 %v3835_v48, %v2738_v49  ;;  %v2720_v55 = vld [vmem:[#allocation4 + $0x88] sm:$0xf]  ;;  %v3833_v56 = vld [vmem:[#allocation4 + $0x94] sm:$0xf0] }
  0x38   :  { %662 = vmatpush.bf16.msrb.mxu2 %v2769_v22  ;;  %v2757_v41 = vor.u32 %v3839_v36, %v2754_v38  ;;  %v2866_v53 = vld [vmem:[#allocation4 + $0x1b8] sm:$0xf0]  ;;  %v3865_v59 = vld [vmem:[#allocation4 + $0x194] sm:$0xf0]  ;;  %v3831_v60 = vld [vmem:[#allocation4 + $0x8c] sm:$0xf] }
  0x39   :  { %676 = vmatpush.bf16.msrb.mxu3 %v2897_v26  ;;  %v2869_v54 = vor.u32 %v3867_v52, %v2866_v53  ;;  %v2722_v61 = vld [vmem:[#allocation4 + $0x98] sm:$0xf0]  ;;  %v2704_v3 = vld [vmem:[#allocation4 + $0x68] sm:$0xf]  ;;  %v3829_v4 = vld [vmem:[#allocation4 + $0x74] sm:$0xf0] }
  0x3a   :  { %636 = vmatpush.bf16.msrb.mxu0 %v2733_v47  ;;  %v3869_v47 = vld [vmem:[#allocation4 + $0x1b4] sm:$0xf0]  ;;  %v2850_v1 = vld [vmem:[#allocation4 + $0x198] sm:$0xf0]  ;;  %v3827_v8 = vld [vmem:[#allocation4 + $0x6c] sm:$0xf] }
  0x3b   :  { %650 = vmatpush.bf16.msrb.mxu1 %v2861_v50  ;;  %v2865_v50 = vor.u32 %v3869_v47, %v2864_v45  ;;  %v3861_v7 = vld [vmem:[#allocation4 + $0x174] sm:$0xf0]  ;;  %v2706_v9 = vld [vmem:[#allocation4 + $0x78] sm:$0xf0]  ;;  %v2688_v14 = vld [vmem:[#allocation4 + $0x48] sm:$0xf] }
  0x3c   :  { %663 = vmatpush.bf16.msrb.mxu2 %v2753_v33  ;;  %v2834_v13 = vld [vmem:[#allocation4 + $0x178] sm:$0xf0]  ;;  %v3825_v16 = vld [vmem:[#allocation4 + $0x54] sm:$0xf0]  ;;  %v3823_v21 = vld [vmem:[#allocation4 + $0x4c] sm:$0xf] }
  0x3d   :  { %677 = vmatpush.bf16.msrb.mxu3 %v2881_v37  ;;  %v2689_v19 = vor.u32 %v3825_v16, %v2688_v14  ;;  %v2690_v22 = vld [vmem:[#allocation4 + $0x58] sm:$0xf0]  ;;  %v3855_v23 = vld [vmem:[#allocation4 + $0x14c] sm:$0xf]  ;;  %v2672_v26 = vld [vmem:[#allocation4 + $0x28] sm:$0xf] }
  0x3e   :  { %637 = vmatpush.bf16.msrb.mxu0 %v2717_v57  ;;  %v2848_v57 = vld [vmem:[#allocation4 + $0x188] sm:$0xf]  ;;  %v2693_v24 = vor.u32 %v3823_v21, %v2690_v22  ;;  %v2818_v25 = vld [vmem:[#allocation4 + $0x158] sm:$0xf0]  ;;  %v3819_v31 = vld [vmem:[#allocation4 + $0x2c] sm:$0xf] }
  0x3f   :  { %651 = vmatpush.bf16.msrb.mxu1 %v2845_v58  ;;  %v2721_v58 = vor.u32 %v3833_v56, %v2720_v55  ;;  %v2849_v62 = vor.u32 %v3865_v59, %v2848_v57  ;;  %v2821_v28 = vor.u32 %v3855_v23, %v2818_v25  ;;  %v2800_v29 = vld [vmem:[#allocation4 + $0x128] sm:$0xf]  ;;  %v2674_v33 = vld [vmem:[#allocation4 + $0x38] sm:$0xf0]  ;;  %v3851_v34 = vld [vmem:[#allocation4 + $0x12c] sm:$0xf] }
  0x40   :  { %664 = vmatpush.bf16.msrb.mxu2 %v2737_v46  ;;  %v2802_v35 = vld [vmem:[#allocation4 + $0x138] sm:$0xf0]  ;;  %v2656_v37 = vld [vmem:[#allocation4 + $0x8] sm:$0xf]  ;;  %v3817_v38 = vld [vmem:[#allocation4 + $0x14] sm:$0xf0]  ;;  %v2677_v39 = vor.u32 %v3819_v31, %v2674_v33 }
  0x41   :  { %678 = vmatpush.bf16.msrb.mxu3 %v2865_v50  ;;  %v2805_v40 = vor.u32 %v3851_v34, %v2802_v35  ;;  %v3815_v43 = vld [vmem:[#allocation4 + $0xc] sm:$0xf]  ;;  %v2658_v44 = vld [vmem:[#allocation4 + $0x18] sm:$0xf0]  ;;  %v2657_v47 = vor.u32 %v3817_v38, %v2656_v37  ;;  %v3072_v16 = vld [vmem:[#allocation6 + $0x150] sm:$0xf] }
  0x42   :  { %638 = vmatpush.bf16.msrb.mxu0 %v2701_v63  ;;  %v2725_v63 = vor.u32 %v3831_v60, %v2722_v61  ;;  %v3847_v45 = vld [vmem:[#allocation4 + $0x10c] sm:$0xf]  ;;  %v2786_v46 = vld [vmem:[#allocation4 + $0x118] sm:$0xf0]  ;;  %v2661_v49 = vor.u32 %v3815_v43, %v2658_v44  ;;  %v3324_v61 = vld [vmem:[#allocation6 + $0x348] sm:$0xf] }
  0x43   :  { %652 = vmatpush.bf16.msrb.mxu1 %v2829_v0  ;;  %v3863_v0 = vld [vmem:[#allocation4 + $0x18c] sm:$0xf]  ;;  %v2789_v50 = vor.u32 %v3847_v45, %v2786_v46  ;;  %v3520_v22 = vld [vmem:[#allocation6 + $0x4d0] sm:$0xf]  ;;  %v3268_v25 = vld [vmem:[#allocation6 + $0x2d8] sm:$0xf] }
  0x44   :  { %665 = vmatpush.bf16.msrb.mxu2 %v2721_v58  ;;  %v2853_v2 = vor.u32 %v3863_v0, %v2850_v1  ;;  %v3930_v1 = vld [vmem:[#allocation6 + $0x1a0] sm:$0xf0]  ;;  %v4091_v21 = vld [vmem:[#allocation6 + $0x6a8] sm:$0xf0]  ;;  %v3716_v31 = vld [vmem:[#allocation6 + $0x658] sm:$0xf] }
  0x45   :  { %679 = vmatpush.bf16.msrb.mxu3 %v2849_v62  ;;  %v3986_v62 = vld [vmem:[#allocation6 + $0x360] sm:$0xf0]  ;;  %v4035_v23 = vld [vmem:[#allocation6 + $0x4e8] sm:$0xf0]  ;;  %v4084_v33 = vld [vmem:[#allocation6 + $0x670] sm:$0xf0] }
  0x46   :  { %639 = vmatpush.bf16.msrb.mxu0 %v2685_v5  ;;  %v2832_v5 = vld [vmem:[#allocation4 + $0x168] sm:$0xf]  ;;  %v3492_v34 = vld [vmem:[#allocation6 + $0x498] sm:$0xf]  ;;  %v4028_v35 = vld [vmem:[#allocation6 + $0x4b0] sm:$0xf0] }
  0x47   :  { %653 = vmatpush.bf16.msrb.mxu1 %v2813_v6  ;;  %v2705_v6 = vor.u32 %v3829_v4, %v2704_v3  ;;  %v2833_v10 = vor.u32 %v3861_v7, %v2832_v5  ;;  %v4098_v3 = vld [vmem:[#allocation6 + $0x6e0] sm:$0xf0]  ;;  %v3240_v37 = vld [vmem:[#allocation6 + $0x2a0] sm:$0xf]  ;;  %v3965_v38 = vld [vmem:[#allocation6 + $0x2b8] sm:$0xf0]  ;;  %v3493_v44 = vor.u32 %v4028_v35, %v3492_v34 }
  0x48   :  { %v4042_v7 = vld [vmem:[#allocation6 + $0x520] sm:$0xf0]  ;;  %v3688_v43 = vld [vmem:[#allocation6 + $0x620] sm:$0xf]  ;;  %v4077_v45 = vld [vmem:[#allocation6 + $0x638] sm:$0xf0] }
  0x49   :  { %666 = vmatpush.bf16.msrb.mxu2 %v2705_v6  ;;  %680 = vmatpush.bf16.msrb.mxu3 %v2833_v10  ;;  %v3548_v6 = vld [vmem:[#allocation6 + $0x508] sm:$0xf]  ;;  %v3464_v46 = vld [vmem:[#allocation6 + $0x460] sm:$0xf] }
  0x4a   :  { %640 = vmatpush.bf16.msrb.mxu0 %v2669_v11  ;;  %v2709_v11 = vor.u32 %v3827_v8, %v2706_v9 }
  0x4b   :  { %654 = vmatpush.bf16.msrb.mxu1 %v2797_v12  ;;  %v3859_v12 = vld [vmem:[#allocation4 + $0x16c] sm:$0xf] }
  0x4c   :  { %v2837_v15 = vor.u32 %v3859_v12, %v2834_v13  ;;  %v3296_v12 = vld [vmem:[#allocation6 + $0x310] sm:$0xf]  ;;  %v3979_v13 = vld [vmem:[#allocation6 + $0x328] sm:$0xf0] }
  0x4d   :  { %667 = vmatpush.bf16.msrb.mxu2 %v2689_v19  ;;  %v3744_v19 = vld [vmem:[#allocation6 + $0x690] sm:$0xf] }
  0x4e   :  { %641 = vmatpush.bf16.msrb.mxu0 %v2653_v17  ;;  %v2816_v17 = vld [vmem:[#allocation4 + $0x148] sm:$0xf] }
  0x4f   :  { %655 = vmatpush.bf16.msrb.mxu1 %v2781_v18  ;;  %v3857_v18 = vld [vmem:[#allocation4 + $0x154] sm:$0xf0] }
  0x50   :  { %v2817_v20 = vor.u32 %v3857_v18, %v2816_v17  ;;  %v3923_v17 = vld [vmem:[#allocation6 + $0x168] sm:$0xf0] }
  0x52   :  { %690 = vmatpush.bf16.msra.mxu0 %v2773_v27  ;;  %v3821_v27 = vld [vmem:[#allocation4 + $0x34] sm:$0xf0]  ;;  %681 = vmatpush.bf16.msrb.mxu3 %v2817_v20  ;;  %v3549_v20 = vor.u32 %v4042_v7, %v3548_v6 }
  0x53   :  { %704 = vmatpush.bf16.msra.mxu1 %v2901_v30  ;;  %v3853_v30 = vld [vmem:[#allocation4 + $0x134] sm:$0xf0]  ;;  %v2673_v32 = vor.u32 %v3821_v27, %v2672_v26  ;;  %v3972_v26 = vld [vmem:[#allocation6 + $0x2f0] sm:$0xf0]  ;;  %v3073_v27 = vor.u32 %v3923_v17, %v3072_v16  ;;  %v3128_v17 = vld [vmem:[#allocation6 + $0x1c0] sm:$0xf] }
  0x54   :  { %v2801_v36 = vor.u32 %v3853_v30, %v2800_v29  ;;  %v3916_v29 = vld [vmem:[#allocation6 + $0x130] sm:$0xf0]  ;;  %v3745_v30 = vor.u32 %v4091_v21, %v3744_v19  ;;  %v3156_v7 = vld [vmem:[#allocation6 + $0x1f8] sm:$0xf]  ;;  %v3881_v21 = vld [vmem:[#allocation6 + $0x18] sm:$0xf0] }
  0x55   :  { %668 = vmatpush.bf16.msrb.mxu2 %v2673_v32  ;;  %v3521_v32 = vor.u32 %v4035_v23, %v3520_v22  ;;  %v4056_v16 = vld [vmem:[#allocation6 + $0x590] sm:$0xf0]  ;;  %v3326_v23 = vld [vmem:[#allocation6 + $0x364] sm:$0xf0] }
  0x56   :  { %691 = vmatpush.bf16.msra.mxu0 %v2757_v41  ;;  %v2784_v41 = vld [vmem:[#allocation4 + $0x108] sm:$0xf]  ;;  %682 = vmatpush.bf16.msrb.mxu3 %v2801_v36  ;;  %v3269_v36 = vor.u32 %v3972_v26, %v3268_v25 }
  0x57   :  { %705 = vmatpush.bf16.msra.mxu1 %v2885_v42  ;;  %v3849_v42 = vld [vmem:[#allocation4 + $0x114] sm:$0xf0]  ;;  %v3102_v25 = vld [vmem:[#allocation6 + $0x1a4] sm:$0xf0] }
  0x58   :  { %v2785_v48 = vor.u32 %v3849_v42, %v2784_v41  ;;  %v3909_v41 = vld [vmem:[#allocation6 + $0xf8] sm:$0xf0]  ;;  %v3717_v42 = vor.u32 %v4084_v33, %v3716_v31  ;;  %v3298_v31 = vld [vmem:[#allocation6 + $0x32c] sm:$0xf0] }
  0x59   :  { %669 = vmatpush.bf16.msrb.mxu2 %v2657_v47  ;;  %v4021_v47 = vld [vmem:[#allocation6 + $0x478] sm:$0xf0]  ;;  %v3074_v33 = vld [vmem:[#allocation6 + $0x16c] sm:$0xf0] }
  0x5a   :  { %692 = vmatpush.bf16.msra.mxu0 %v2741_v51  ;;  %683 = vmatpush.bf16.msrb.mxu3 %v2785_v48  ;;  %v92_v51 = vld [vmem:[%s4383_s2] sm:$0x3]  ;;  %v3241_v48 = vor.u32 %v3965_v38, %v3240_v37  ;;  %v3270_v37 = vld [vmem:[#allocation6 + $0x2f4] sm:$0xf0] }
  0x5b   :  { %706 = vmatpush.bf16.msra.mxu1 %v2869_v54  ;;  %v94_v54 = vperm.slane %v92_v51, 0  ;;  %v95_v55 = vperm.slane %v92_v51, 1 }
  0x5e   :  { %693 = vmatpush.bf16.msra.mxu0 %v2725_v63  ;;  %v3100_v63 = vld [vmem:[#allocation6 + $0x188] sm:$0xf] }
  0x5f   :  { %707 = vmatpush.bf16.msra.mxu1 %v2853_v2  ;;  %v3772_v2 = vld [vmem:[#allocation6 + $0x6c8] sm:$0xf]  ;;  %v3101_v14 = vor.u32 %v3930_v1, %v3100_v63  ;;  %v3951_v63 = vld [vmem:[#allocation6 + $0x248] sm:$0xf0] }
  0x60   :  { %v3773_v18 = vor.u32 %v4098_v3, %v3772_v2  ;;  %v3895_v1 = vld [vmem:[#allocation6 + $0x88] sm:$0xf0] }
  0x62   :  { %694 = vmatpush.bf16.msra.mxu0 %v2709_v11  ;;  %v3325_v11 = vor.u32 %v3986_v62, %v3324_v61  ;;  %v3184_v61 = vld [vmem:[#allocation6 + $0x230] sm:$0xf] }
  0x63   :  { %708 = vmatpush.bf16.msra.mxu1 %v2837_v15  ;;  %v3185_v6 = vor.u32 %v3951_v63, %v3184_v61  ;;  %v3018_v61 = vld [vmem:[#allocation6 + $0xfc] sm:$0xf0]  ;;  %v3948_v63 = vld [vmem:[#allocation6 + $0x234] sm:$0xf] }
  0x66   :  { %695 = vmatpush.bf16.msra.mxu0 %v2693_v24  ;;  %v3297_v24 = vor.u32 %v3979_v13, %v3296_v12  ;;  %v3888_v12 = vld [vmem:[#allocation6 + $0x50] sm:$0xf0] }
  0x67   :  { %709 = vmatpush.bf16.msra.mxu1 %v2821_v28  ;;  %v3044_v28 = vld [vmem:[#allocation6 + $0x118] sm:$0xf] }
  0x6a   :  { %696 = vmatpush.bf16.msra.mxu0 %v2677_v39  ;;  %v3045_v39 = vor.u32 %v3916_v29, %v3044_v28  ;;  %v3976_v29 = vld [vmem:[#allocation6 + $0x314] sm:$0xf] }
  0x6b   :  { %710 = vmatpush.bf16.msra.mxu1 %v2805_v40  ;;  %v3016_v40 = vld [vmem:[#allocation6 + $0xe0] sm:$0xf]  ;;  %v3301_v34 = vor.u32 %v3976_v29, %v3298_v31 }
  0x6c   :  { %v3017_v51 = vor.u32 %v3909_v41, %v3016_v40  ;;  %v3242_v40 = vld [vmem:[#allocation6 + $0x2bc] sm:$0xf0] }
  0x6e   :  { %697 = vmatpush.bf16.msra.mxu0 %v2661_v49  ;;  %v3212_v49 = vld [vmem:[#allocation6 + $0x268] sm:$0xf] }
  0x6f   :  { %711 = vmatpush.bf16.msra.mxu1 %v2789_v50  ;;  %v3958_v50 = vld [vmem:[#allocation6 + $0x280] sm:$0xf0] }
  0xae   :  { %v187_v52 = vpop.f32.mrf.mxu0 }
  0xaf   :  { %v201_v53 = vpop.f32.mrf.mxu1  ;;  %v188_v56 = vadd.f32 %v187_v52, %v94_v54  ;;  %v2988_v52 = vld [vmem:[#allocation6 + $0xa8] sm:$0xf] }
  0xb0   :  { %v202_v57 = vadd.f32 %v201_v53, %v95_v55  ;;  %v3902_v53 = vld [vmem:[#allocation6 + $0xc0] sm:$0xf0] }
  0xb1   :  { %v206_v4 = vmax.f32 %v188_v56, 0.0  ;;  %v3465_v56 = vor.u32 %v4021_v47, %v3464_v46  ;;  %v2989_v62 = vor.u32 %v3902_v53, %v2988_v52  ;;  %v3046_v46 = vld [vmem:[#allocation6 + $0x134] sm:$0xf0]  ;;  %v3214_v52 = vld [vmem:[#allocation6 + $0x284] sm:$0xf0] }
  0xb2   :  { %v207_v8 = vmax.f32 %v202_v57, 0.0  ;;  %v4070_v57 = vld [vmem:[#allocation6 + $0x600] sm:$0xf0]  ;;  %v4095_v53 = vld [vmem:[#allocation6 + $0x6cc] sm:$0xf] }
  0xb6   :  { %v189_v58 = vpop.f32.mrf.mxu0 }
  0xb7   :  { %v190_v59 = vadd.f32 %v189_v58, %v94_v54  ;;  %v203_v60 = vpop.f32.mrf.mxu1  ;;  %v3689_v54 = vor.u32 %v4077_v45, %v3688_v43  ;;  %v3436_v58 = vld [vmem:[#allocation6 + $0x428] sm:$0xf]  ;;  %v4007_v43 = vld [vmem:[#allocation6 + $0x408] sm:$0xf0]  ;;  %v3913_v45 = vld [vmem:[#allocation6 + $0x11c] sm:$0xf] }
  0xb8   :  { %v204_v0 = vadd.f32 %v203_v60, %v95_v55  ;;  %v3660_v55 = vld [vmem:[#allocation6 + $0x5e8] sm:$0xf]  ;;  %v3213_v60 = vor.u32 %v3958_v50, %v3212_v49  ;;  %v3049_v47 = vor.u32 %v3913_v45, %v3046_v46  ;;  %v4049_v49 = vld [vmem:[#allocation6 + $0x558] sm:$0xf0]  ;;  %v3466_v45 = vld [vmem:[#allocation6 + $0x47c] sm:$0xf0] }
  0xb9   :  { %v208_v5 = vmax.f32 %v190_v59, 0.0  ;;  %v4014_v59 = vld [vmem:[#allocation6 + $0x440] sm:$0xf0]  ;;  %v3661_v2 = vor.u32 %v4070_v57, %v3660_v55  ;;  %v3774_v55 = vld [vmem:[#allocation6 + $0x6e4] sm:$0xf0] }
  0xba   :  { %v209_v9 = vmax.f32 %v204_v0, 0.0  ;;  %v2960_v0 = vld [vmem:[#allocation6 + $0x70] sm:$0xf]  ;;  %v3437_v3 = vor.u32 %v4014_v59, %v3436_v58  ;;  %v4000_v57 = vld [vmem:[#allocation6 + $0x3d0] sm:$0xf0]  ;;  %v3777_v58 = vor.u32 %v4095_v53, %v3774_v55 }
  0xbb   :  { %v4282_v10 = vpack.c.bf16 %v208_v5, %v206_v4  ;;  %v3632_v4 = vld [vmem:[#allocation6 + $0x5b0] sm:$0xf]  ;;  %v4063_v5 = vld [vmem:[#allocation6 + $0x5c8] sm:$0xf0]  ;;  %v4053_v53 = vld [vmem:[#allocation6 + $0x57c] sm:$0xf] }
  0xbc   :  { %v4284_v15 = vpack.c.bf16 %v209_v9, %v207_v8  ;;  %v2961_v8 = vor.u32 %v3895_v1, %v2960_v0  ;;  %v3944_v9 = vld [vmem:[#allocation6 + $0x210] sm:$0xf0]  ;;  %v3633_v13 = vor.u32 %v4063_v5, %v3632_v4  ;;  %v3186_v0 = vld [vmem:[#allocation6 + $0x24c] sm:$0xf0]  ;;  %v3352_v4 = vld [vmem:[#allocation6 + $0x380] sm:$0xf] }
  0xbd   :  { %614 = vmatmul.bf16.vlgmr.msra.gmra.mxu2 %v4282_v10  ;;  %642 = vmatmul.bf16.vlgmr.msrb.gmra.mxu0 %v4282_v10  ;;  %v4088_v1 = vld [vmem:[#allocation6 + $0x694] sm:$0xf]  ;;  %v3993_v5 = vld [vmem:[#allocation6 + $0x398] sm:$0xf0] }
  0xbe   :  { %628 = vmatmul.bf16.vlgmr.msra.gmra.mxu3 %v4284_v15  ;;  %656 = vmatmul.bf16.vlgmr.msrb.gmra.mxu1 %v4284_v15 }
  0xbf   :  { %2168 = vmatpush.bf16.msra.mxu3 %v3325_v11  ;;  %2154 = vmatpush.bf16.msra.mxu2 %v3101_v14  ;;  %v2932_v11 = vld [vmem:[#allocation6 + $0x38] sm:$0xf] }
  0xc0   :  { %2196 = vmatpush.bf16.msrb.mxu1 %v3773_v18  ;;  %2182 = vmatpush.bf16.msrb.mxu0 %v3549_v20  ;;  %v3604_v14 = vld [vmem:[#allocation6 + $0x578] sm:$0xf]  ;;  %v3937_v18 = vld [vmem:[#allocation6 + $0x1d8] sm:$0xf0]  ;;  %v2933_v19 = vor.u32 %v3888_v12, %v2932_v11  ;;  %v2904_v20 = vld [vmem:[#allocation6] sm:$0xf] }
  0xc1   :  { %v3605_v22 = vor.u32 %v4056_v16, %v3604_v14  ;;  %v3129_v26 = vor.u32 %v3937_v18, %v3128_v17  ;;  %v4039_v11 = vld [vmem:[#allocation6 + $0x50c] sm:$0xf]  ;;  %v3941_v16 = vld [vmem:[#allocation6 + $0x1fc] sm:$0xf] }
  0xc2   :  { %v4081_v17 = vld [vmem:[#allocation6 + $0x65c] sm:$0xf] }
  0xc3   :  { %2169 = vmatpush.bf16.msra.mxu3 %v3297_v24  ;;  %2155 = vmatpush.bf16.msra.mxu2 %v3073_v27  ;;  %v3927_v24 = vld [vmem:[#allocation6 + $0x18c] sm:$0xf]  ;;  %v2905_v27 = vor.u32 %v3881_v21, %v2904_v20  ;;  %v3892_v20 = vld [vmem:[#allocation6 + $0x74] sm:$0xf]  ;;  %v2962_v21 = vld [vmem:[#allocation6 + $0x8c] sm:$0xf0] }
  0xc4   :  { %2197 = vmatpush.bf16.msrb.mxu1 %v3745_v30  ;;  %2183 = vmatpush.bf16.msrb.mxu0 %v3521_v32  ;;  %v3105_v30 = vor.u32 %v3927_v24, %v3102_v25  ;;  %v3920_v32 = vld [vmem:[#allocation6 + $0x154] sm:$0xf]  ;;  %v3522_v24 = vld [vmem:[#allocation6 + $0x4ec] sm:$0xf0] }
  0xc5   :  { %v3077_v35 = vor.u32 %v3920_v32, %v3074_v33  ;;  %v3885_v32 = vld [vmem:[#allocation6 + $0x3c] sm:$0xf]  ;;  %v2934_v33 = vld [vmem:[#allocation6 + $0x54] sm:$0xf0] }
  0xc7   :  { %2170 = vmatpush.bf16.msra.mxu3 %v3269_v36  ;;  %2156 = vmatpush.bf16.msra.mxu2 %v3045_v39  ;;  %v3969_v36 = vld [vmem:[#allocation6 + $0x2dc] sm:$0xf]  ;;  %v3962_v39 = vld [vmem:[#allocation6 + $0x2a4] sm:$0xf] }
  0xc8   :  { %2198 = vmatpush.bf16.msrb.mxu1 %v3717_v42  ;;  %2184 = vmatpush.bf16.msrb.mxu0 %v3493_v44  ;;  %v3273_v38 = vor.u32 %v3969_v36, %v3270_v37  ;;  %v3245_v41 = vor.u32 %v3962_v39, %v3242_v40  ;;  %v3408_v42 = vld [vmem:[#allocation6 + $0x3f0] sm:$0xf]  ;;  %v3494_v36 = vld [vmem:[#allocation6 + $0x4b4] sm:$0xf0]  ;;  %v3662_v39 = vld [vmem:[#allocation6 + $0x604] sm:$0xf0] }
  0xc9   :  { %v3409_v44 = vor.u32 %v4007_v43, %v3408_v42  ;;  %v2906_v42 = vld [vmem:[#allocation6 + $0x1c] sm:$0xf0]  ;;  %v4018_v43 = vld [vmem:[#allocation6 + $0x464] sm:$0xf] }
  0xca   :  { %v3469_v46 = vor.u32 %v4018_v43, %v3466_v45  ;;  %v3924_v45 = vld [vmem:[#allocation6 + $0x170] sm:$0xf0] }
  0xcb   :  { %2171 = vmatpush.bf16.msra.mxu3 %v3241_v48  ;;  %2157 = vmatpush.bf16.msra.mxu2 %v3017_v51  ;;  %v3576_v48 = vld [vmem:[#allocation6 + $0x540] sm:$0xf]  ;;  %v3955_v51 = vld [vmem:[#allocation6 + $0x26c] sm:$0xf] }
  0xcc   :  { %2199 = vmatpush.bf16.msrb.mxu1 %v3689_v54  ;;  %2185 = vmatpush.bf16.msrb.mxu0 %v3465_v56  ;;  %v3577_v50 = vor.u32 %v4049_v49, %v3576_v48  ;;  %v3217_v54 = vor.u32 %v3955_v51, %v3214_v52  ;;  %v3380_v56 = vld [vmem:[#allocation6 + $0x3b8] sm:$0xf]  ;;  %v3634_v48 = vld [vmem:[#allocation6 + $0x5cc] sm:$0xf0]  ;;  %v3438_v51 = vld [vmem:[#allocation6 + $0x444] sm:$0xf0] }
  0xcd   :  { %670 = vmatmul.bf16.vlgmr.msrb.gmra.mxu2 %v4282_v10  ;;  %698 = vmatmul.bf16.vlgmr.msra.gmra.mxu0 %v4282_v10  ;;  %v3157_v10 = vor.u32 %v3944_v9, %v3156_v7  ;;  %v3381_v59 = vor.u32 %v4000_v57, %v3380_v56  ;;  %v3353_v7 = vor.u32 %v3993_v5, %v3352_v4  ;;  %v2990_v9 = vld [vmem:[#allocation6 + $0xc4] sm:$0xf0]  ;;  %v4004_v56 = vld [vmem:[#allocation6 + $0x3f4] sm:$0xf]  ;;  %v3410_v57 = vld [vmem:[#allocation6 + $0x40c] sm:$0xf0] }
  0xce   :  { %684 = vmatmul.bf16.vlgmr.msrb.gmra.mxu3 %v4284_v15  ;;  %712 = vmatmul.bf16.vlgmr.msra.gmra.mxu1 %v4284_v15  ;;  %v3983_v15 = vld [vmem:[#allocation6 + $0x34c] sm:$0xf]  ;;  %v3990_v5 = vld [vmem:[#allocation6 + $0x384] sm:$0xf] }
  0xcf   :  { %2172 = vmatpush.bf16.msra.mxu3 %v3213_v60  ;;  %2158 = vmatpush.bf16.msra.mxu2 %v2989_v62  ;;  %v3329_v28 = vor.u32 %v3983_v15, %v3326_v23  ;;  %v3906_v60 = vld [vmem:[#allocation6 + $0xe4] sm:$0xf]  ;;  %v2965_v23 = vor.u32 %v3892_v20, %v2962_v21 }
  0xd0   :  { %2200 = vmatpush.bf16.msrb.mxu1 %v3661_v2  ;;  %2186 = vmatpush.bf16.msrb.mxu0 %v3437_v3  ;;  %v3021_v62 = vor.u32 %v3906_v60, %v3018_v61  ;;  %v3189_v2 = vor.u32 %v3948_v63, %v3186_v0  ;;  %v3746_v3 = vld [vmem:[#allocation6 + $0x6ac] sm:$0xf0]  ;;  %v4046_v60 = vld [vmem:[#allocation6 + $0x544] sm:$0xf]  ;;  %v3578_v61 = vld [vmem:[#allocation6 + $0x55c] sm:$0xf0] }
  0xd1   :  { %v3997_v0 = vld [vmem:[#allocation6 + $0x3bc] sm:$0xf] }
  0xd3   :  { %2173 = vmatpush.bf16.msra.mxu3 %v3185_v6  ;;  %2159 = vmatpush.bf16.msra.mxu2 %v2961_v8  ;;  %v3749_v6 = vor.u32 %v4088_v1, %v3746_v3  ;;  %v3899_v8 = vld [vmem:[#allocation6 + $0xac] sm:$0xf]  ;;  %v3382_v1 = vld [vmem:[#allocation6 + $0x3d4] sm:$0xf0] }
  0xd4   :  { %2201 = vmatpush.bf16.msrb.mxu1 %v3633_v13  ;;  %2187 = vmatpush.bf16.msrb.mxu0 %v3409_v44  ;;  %v2993_v12 = vor.u32 %v3899_v8, %v2990_v9  ;;  %v3550_v13 = vld [vmem:[#allocation6 + $0x524] sm:$0xf0]  ;;  %v3385_v4 = vor.u32 %v3997_v0, %v3382_v1  ;;  %v3959_v0 = vld [vmem:[#allocation6 + $0x288] sm:$0xf0] }
  0xd5   :  { %v3553_v14 = vor.u32 %v4039_v11, %v3550_v13  ;;  %v4099_v1 = vld [vmem:[#allocation6 + $0x6e8] sm:$0xf0] }
  0xd7   :  { %2174 = vmatpush.bf16.msra.mxu3 %v3157_v10  ;;  %2160 = vmatpush.bf16.msra.mxu2 %v2933_v19  ;;  %v3158_v10 = vld [vmem:[#allocation6 + $0x214] sm:$0xf0] }
  0xd8   :  { %2202 = vmatpush.bf16.msrb.mxu1 %v3605_v22  ;;  %2188 = vmatpush.bf16.msrb.mxu0 %v3381_v59  ;;  %v3161_v18 = vor.u32 %v3941_v16, %v3158_v10  ;;  %v3718_v19 = vld [vmem:[#allocation6 + $0x674] sm:$0xf0]  ;;  %v4032_v22 = vld [vmem:[#allocation6 + $0x4d4] sm:$0xf]  ;;  %v4297_v59 = vld [vmem:[%s4385_s4] sm:$0xf] }
  0xd9   :  { %v3721_v15 = vor.u32 %v4081_v17, %v3718_v19  ;;  %v3525_v25 = vor.u32 %v4032_v22, %v3522_v24  ;;  %v278_v11 = vperm.slane %v4297_v59, 0  ;;  %v3332_v19 = vld [vmem:[#allocation6 + $0x350] sm:$0xf] }
  0xdb   :  { %2175 = vmatpush.bf16.msra.mxu3 %v3129_v26  ;;  %2161 = vmatpush.bf16.msra.mxu2 %v2905_v27  ;;  %v3934_v26 = vld [vmem:[#allocation6 + $0x1c4] sm:$0xf]  ;;  %v3130_v27 = vld [vmem:[#allocation6 + $0x1dc] sm:$0xf0] }
  0xdc   :  { %2203 = vmatpush.bf16.msrb.mxu1 %v3577_v50  ;;  %2189 = vmatpush.bf16.msrb.mxu0 %v3353_v7  ;;  %v3133_v29 = vor.u32 %v3934_v26, %v3130_v27  ;;  %v4011_v50 = vld [vmem:[#allocation6 + $0x42c] sm:$0xf] }
  0xdd   :  { %v3441_v52 = vor.u32 %v4011_v50, %v3438_v51  ;;  %v3248_v50 = vld [vmem:[#allocation6 + $0x2a8] sm:$0xf]  ;;  %v3966_v51 = vld [vmem:[#allocation6 + $0x2c0] sm:$0xf0] }
  0xdf   :  { %2224 = vmatpush.bf16.msrb.mxu3 %v3329_v28  ;;  %2210 = vmatpush.bf16.msrb.mxu2 %v3105_v30  ;;  %v4074_v28 = vld [vmem:[#allocation6 + $0x624] sm:$0xf]  ;;  %v3690_v30 = vld [vmem:[#allocation6 + $0x63c] sm:$0xf0] }
  0xe0   :  { %2252 = vmatpush.bf16.msra.mxu1 %v3777_v58  ;;  %2238 = vmatpush.bf16.msra.mxu0 %v3553_v14  ;;  %v3693_v31 = vor.u32 %v4074_v28, %v3690_v30  ;;  %v3413_v58 = vor.u32 %v4004_v56, %v3410_v57  ;;  %v3304_v28 = vld [vmem:[#allocation6 + $0x318] sm:$0xf]  ;;  %v3052_v56 = vld [vmem:[#allocation6 + $0x120] sm:$0xf]  ;;  %v3917_v57 = vld [vmem:[#allocation6 + $0x138] sm:$0xf0] }
  0xe3   :  { %2225 = vmatpush.bf16.msrb.mxu3 %v3301_v34  ;;  %2211 = vmatpush.bf16.msrb.mxu2 %v3077_v35  ;;  %v2937_v34 = vor.u32 %v3885_v32, %v2934_v33  ;;  %v4025_v35 = vld [vmem:[#allocation6 + $0x49c] sm:$0xf]  ;;  %v281_v32 = vperm.slane %v4297_v59, 3 }
  0xe4   :  { %2253 = vmatpush.bf16.msra.mxu1 %v3749_v6  ;;  %2239 = vmatpush.bf16.msra.mxu0 %v3525_v25  ;;  %v3497_v37 = vor.u32 %v4025_v35, %v3494_v36  ;;  %v3354_v6 = vld [vmem:[#allocation6 + $0x39c] sm:$0xf0]  ;;  %v3931_v35 = vld [vmem:[#allocation6 + $0x1a8] sm:$0xf0] }
  0xe5   :  { %v3357_v8 = vor.u32 %v3990_v5, %v3354_v6  ;;  %v3024_v5 = vld [vmem:[#allocation6 + $0xe8] sm:$0xf]  ;;  %v3910_v6 = vld [vmem:[#allocation6 + $0x100] sm:$0xf0] }
  0xe7   :  { %2226 = vmatpush.bf16.msrb.mxu3 %v3273_v38  ;;  %2212 = vmatpush.bf16.msrb.mxu2 %v3049_v47  ;;  %v4067_v38 = vld [vmem:[#allocation6 + $0x5ec] sm:$0xf]  ;;  %v4060_v47 = vld [vmem:[#allocation6 + $0x5b4] sm:$0xf] }
  0xe8   :  { %2254 = vmatpush.bf16.msra.mxu1 %v3721_v15  ;;  %v3665_v40 = vor.u32 %v4067_v38, %v3662_v39  ;;  %2240 = vmatpush.bf16.msra.mxu0 %v3497_v37  ;;  %v3637_v49 = vor.u32 %v4060_v47, %v3634_v48  ;;  %v3987_v15 = vld [vmem:[#allocation6 + $0x368] sm:$0xf0]  ;;  %v3276_v39 = vld [vmem:[#allocation6 + $0x2e0] sm:$0xf]  ;;  %v280_v48 = vperm.slane %v4297_v59, 2 }
  0xeb   :  { %2227 = vmatpush.bf16.msrb.mxu3 %v3245_v41  ;;  %2213 = vmatpush.bf16.msrb.mxu2 %v3021_v62  ;;  %v3878_v41 = vld [vmem:[#allocation6 + $0x4] sm:$0xf]  ;;  %v3581_v62 = vor.u32 %v4046_v60, %v3578_v61  ;;  %v3249_v60 = vor.u32 %v3966_v51, %v3248_v50  ;;  %v3220_v61 = vld [vmem:[#allocation6 + $0x270] sm:$0xf]  ;;  %v2940_v51 = vld [vmem:[#allocation6 + $0x40] sm:$0xf] }
  0xec   :  { %2255 = vmatpush.bf16.msra.mxu1 %v3693_v31  ;;  %v2909_v44 = vor.u32 %v3878_v41, %v2906_v42  ;;  %2241 = vmatpush.bf16.msra.mxu0 %v3469_v46  ;;  %v3334_v50 = vld [vmem:[#allocation6 + $0x36c] sm:$0xf0] }
  0xef   :  { %2228 = vmatpush.bf16.msrb.mxu3 %v3217_v54  ;;  %2214 = vmatpush.bf16.msrb.mxu2 %v2993_v12  ;;  %v3606_v54 = vld [vmem:[#allocation6 + $0x594] sm:$0xf0] }
  0xf0   :  { %2256 = vmatpush.bf16.msra.mxu1 %v3665_v40  ;;  %v3609_v55 = vor.u32 %v4053_v53, %v3606_v54  ;;  %2242 = vmatpush.bf16.msra.mxu0 %v3441_v52  ;;  %v3973_v40 = vld [vmem:[#allocation6 + $0x2f8] sm:$0xf0] }
  0xf1   :  { %v3277_v47 = vor.u32 %v3973_v40, %v3276_v39  ;;  %v4036_v39 = vld [vmem:[#allocation6 + $0x4f0] sm:$0xf0] }
  0xf3   :  { %2229 = vmatpush.bf16.msrb.mxu3 %v3189_v2  ;;  %2215 = vmatpush.bf16.msrb.mxu2 %v2965_v23  ;;  %v279_v2 = vperm.slane %v4297_v59, 1  ;;  %v3333_v23 = vor.u32 %v3987_v15, %v3332_v19  ;;  %v3780_v59 = vld [vmem:[#allocation6 + $0x6d0] sm:$0xf]  ;;  %v3025_v19 = vor.u32 %v3910_v6, %v3024_v5  ;;  %v3928_v5 = vld [vmem:[#allocation6 + $0x194] sm:$0xf] }
  0xf4   :  { %2257 = vmatpush.bf16.msra.mxu1 %v3637_v49  ;;  %2243 = vmatpush.bf16.msra.mxu0 %v3413_v58  ;;  %v2996_v15 = vld [vmem:[#allocation6 + $0xb0] sm:$0xf] }
  0xf5   :  { %v3110_v6 = vld [vmem:[#allocation6 + $0x1ac] sm:$0xf0] }
  0xf7   :  { %2230 = vmatpush.bf16.msrb.mxu3 %v3161_v18  ;;  %2216 = vmatpush.bf16.msrb.mxu2 %v2937_v34  ;;  %v3108_v34 = vld [vmem:[#allocation6 + $0x190] sm:$0xf] }
  0xf8   :  { %2258 = vmatpush.bf16.msra.mxu1 %v3609_v55  ;;  %2244 = vmatpush.bf16.msra.mxu0 %v3385_v4  ;;  %v3109_v41 = vor.u32 %v3931_v35, %v3108_v34  ;;  %v2968_v35 = vld [vmem:[#allocation6 + $0x78] sm:$0xf] }
  0xfb   :  { %2231 = vmatpush.bf16.msrb.mxu3 %v3133_v29  ;;  %2217 = vmatpush.bf16.msrb.mxu2 %v2909_v44  ;;  %v3980_v29 = vld [vmem:[#allocation6 + $0x330] sm:$0xf0]  ;;  %v3080_v44 = vld [vmem:[#allocation6 + $0x158] sm:$0xf] }
  0xfc   :  { %2259 = vmatpush.bf16.msra.mxu1 %v3581_v62  ;;  %2245 = vmatpush.bf16.msra.mxu0 %v3357_v8  ;;  %v3305_v36 = vor.u32 %v3980_v29, %v3304_v28  ;;  %v3081_v53 = vor.u32 %v3924_v45, %v3080_v44  ;;  %v3221_v8 = vor.u32 %v3959_v0, %v3220_v61  ;;  %v3945_v28 = vld [vmem:[#allocation6 + $0x218] sm:$0xf0]  ;;  %v3938_v44 = vld [vmem:[#allocation6 + $0x1e0] sm:$0xf0]  ;;  %v3696_v45 = vld [vmem:[#allocation6 + $0x628] sm:$0xf] }
  0xfd   :  { %v3306_v0 = vld [vmem:[#allocation6 + $0x334] sm:$0xf0] }
 0x13a   :  { %v643_v63 = vpop.f32.mrf.mxu0 }
 0x13b   :  { %v657_v3 = vpop.f32.mrf.mxu1  ;;  %v644_v7 = vadd.f32 %v643_v63, %v279_v2 }
 0x13d   :  { %v658_v14 = vadd.f32 %v657_v3, %v644_v7 }
 0x13f   :  { %v719_v20 = vmax.f32 %v658_v14, 0.0 }
 0x140   :  { %v615_v9 = vpop.f32.mrf.mxu2 }
 0x141   :  { %v629_v12 = vpop.f32.mrf.mxu3  ;;  %v616_v17 = vadd.f32 %v615_v9, %v278_v11  ;;  %v3781_v9 = vor.u32 %v4099_v1, %v3780_v59  ;;  %v2912_v59 = vld [vmem:[#allocation6 + $0x8] sm:$0xf]  ;;  %v3882_v1 = vld [vmem:[#allocation6 + $0x20] sm:$0xf0] }
 0x142   :  { %v645_v13 = vpop.f32.mrf.mxu0 }
 0x143   :  { %v646_v16 = vadd.f32 %v645_v13, %v279_v2  ;;  %v659_v10 = vpop.f32.mrf.mxu1  ;;  %v630_v24 = vadd.f32 %v629_v12, %v616_v17  ;;  %v3053_v2 = vor.u32 %v3917_v57, %v3052_v56  ;;  %v4092_v17 = vld [vmem:[#allocation6 + $0x6b0] sm:$0xf0] }
 0x145   :  { %v660_v18 = vadd.f32 %v659_v10, %v646_v16  ;;  %v718_v37 = vmax.f32 %v630_v24, 0.0  ;;  %v3952_v16 = vld [vmem:[#allocation6 + $0x250] sm:$0xf0]  ;;  %v3752_v10 = vld [vmem:[#allocation6 + $0x698] sm:$0xf] }
 0x147   :  { %v723_v21 = vmax.f32 %v660_v18, 0.0 }
 0x148   :  { %v617_v22 = vpop.f32.mrf.mxu2 }
 0x149   :  { %v4301_v25 = vpack.c.bf16 %v723_v21, %v719_v20  ;;  %v618_v26 = vadd.f32 %v617_v22, %v278_v11  ;;  %v631_v27 = vpop.f32.mrf.mxu3  ;;  %v3192_v11 = vld [vmem:[#allocation6 + $0x238] sm:$0xf]  ;;  %v3903_v21 = vld [vmem:[#allocation6 + $0xc8] sm:$0xf0]  ;;  %v3556_v22 = vld [vmem:[#allocation6 + $0x510] sm:$0xf] }
 0x14a   :  { %v699_v30 = vpop.f32.mrf.mxu0  ;;  %v3193_v24 = vor.u32 %v3952_v16, %v3192_v11  ;;  %v2913_v11 = vor.u32 %v3882_v1, %v2912_v59  ;;  %v3278_v16 = vld [vmem:[#allocation6 + $0x2fc] sm:$0xf0] }
 0x14b   :  { %v632_v31 = vadd.f32 %v631_v27, %v618_v26  ;;  %v713_v33 = vpop.f32.mrf.mxu1  ;;  %2176 = vmatmul.bf16.vlgmr.msra.gmra.mxu3 %v4301_v25  ;;  %v700_v43 = vadd.f32 %v699_v30, %v281_v32  ;;  %v3753_v26 = vor.u32 %v4092_v17, %v3752_v10  ;;  %v3164_v27 = vld [vmem:[#allocation6 + $0x200] sm:$0xf]  ;;  %v3113_v10 = vor.u32 %v3928_v5, %v3110_v6  ;;  %v3444_v17 = vld [vmem:[#allocation6 + $0x430] sm:$0xf]  ;;  %v4082_v5 = vld [vmem:[#allocation6 + $0x664] sm:$0xf] }
 0x14c   :  { %2280 = vmatpush.bf16.msra.mxu3 %v3333_v23  ;;  %v4043_v23 = vld [vmem:[#allocation6 + $0x528] sm:$0xf0]  ;;  %v3165_v40 = vor.u32 %v3945_v28, %v3164_v27  ;;  %v3250_v27 = vld [vmem:[#allocation6 + $0x2c4] sm:$0xf0]  ;;  %v3726_v6 = vld [vmem:[#allocation6 + $0x67c] sm:$0xf0] }
 0x14d   :  { %v722_v38 = vmax.f32 %v632_v31, 0.0  ;;  %v714_v54 = vadd.f32 %v713_v33, %v700_v43  ;;  %v3724_v31 = vld [vmem:[#allocation6 + $0x660] sm:$0xf]  ;;  %v2997_v33 = vor.u32 %v3903_v21, %v2996_v15  ;;  %v3557_v34 = vor.u32 %v4043_v23, %v3556_v22  ;;  %v3136_v43 = vld [vmem:[#allocation6 + $0x1c8] sm:$0xf] }
 0x14e   :  { %v3921_v15 = vld [vmem:[#allocation6 + $0x15c] sm:$0xf]  ;;  %v3612_v22 = vld [vmem:[#allocation6 + $0x580] sm:$0xf] }
 0x14f   :  { %v4305_v42 = vpack.c.bf16 %v722_v38, %v718_v37  ;;  %v721_v3 = vmax.f32 %v714_v54, 0.0  ;;  %v3896_v37 = vld [vmem:[#allocation6 + $0x90] sm:$0xf0]  ;;  %v3528_v38 = vld [vmem:[#allocation6 + $0x4d8] sm:$0xf] }
 0x150   :  { %2281 = vmatpush.bf16.msra.mxu3 %v3305_v36  ;;  %v671_v46 = vpop.f32.mrf.mxu2  ;;  %v4029_v54 = vld [vmem:[#allocation6 + $0x4b8] sm:$0xf0] }
 0x151   :  { %v685_v49 = vpop.f32.mrf.mxu3  ;;  %2162 = vmatmul.bf16.vlgmr.msra.gmra.mxu2 %v4305_v42  ;;  %v672_v62 = vadd.f32 %v671_v46, %v280_v48  ;;  %v4078_v46 = vld [vmem:[#allocation6 + $0x640] sm:$0xf0]  ;;  %v4057_v23 = vld [vmem:[#allocation6 + $0x598] sm:$0xf0] }
 0x152   :  { %2266 = vmatpush.bf16.msra.mxu2 %v3109_v41  ;;  %v701_v52 = vpop.f32.mrf.mxu0  ;;  %v3697_v56 = vor.u32 %v4078_v46, %v3696_v45  ;;  %v3388_v45 = vld [vmem:[#allocation6 + $0x3c0] sm:$0xf]  ;;  %v4001_v46 = vld [vmem:[#allocation6 + $0x3d8] sm:$0xf0] }
 0x153   :  { %v702_v55 = vadd.f32 %v701_v52, %v281_v32  ;;  %v715_v58 = vpop.f32.mrf.mxu1  ;;  %v686_v12 = vadd.f32 %v685_v49, %v672_v62  ;;  %v4085_v32 = vld [vmem:[#allocation6 + $0x678] sm:$0xf0]  ;;  %v3984_v49 = vld [vmem:[#allocation6 + $0x354] sm:$0xf] }
 0x154   :  { %2282 = vmatpush.bf16.msra.mxu3 %v3277_v47  ;;  %v3725_v41 = vor.u32 %v4085_v32, %v3724_v31  ;;  %v2969_v47 = vor.u32 %v3896_v37, %v2968_v35  ;;  %v3889_v52 = vld [vmem:[#allocation6 + $0x58] sm:$0xf0]  ;;  %v3337_v57 = vor.u32 %v3984_v49, %v3334_v50  ;;  %v3613_v31 = vor.u32 %v4057_v23, %v3612_v22  ;;  %v3914_v32 = vld [vmem:[#allocation6 + $0x124] sm:$0xf]  ;;  %v3584_v35 = vld [vmem:[#allocation6 + $0x548] sm:$0xf] }
 0x155   :  { %v716_v63 = vadd.f32 %v715_v58, %v702_v55  ;;  %v720_v29 = vmax.f32 %v686_v12, 0.0  ;;  %v3137_v55 = vor.u32 %v3938_v44, %v3136_v43  ;;  %v3668_v58 = vld [vmem:[#allocation6 + $0x5f0] sm:$0xf]  ;;  %v2941_v61 = vor.u32 %v3889_v52, %v2940_v51  ;;  %v4050_v37 = vld [vmem:[#allocation6 + $0x560] sm:$0xf0] }
 0x156   :  { %2267 = vmatpush.bf16.msra.mxu2 %v3081_v53  ;;  %v3500_v53 = vld [vmem:[#allocation6 + $0x4a0] sm:$0xf]  ;;  %v3782_v43 = vld [vmem:[#allocation6 + $0x6ec] sm:$0xf0]  ;;  %v3026_v49 = vld [vmem:[#allocation6 + $0x104] sm:$0xf0] }
 0x157   :  { %v725_v4 = vmax.f32 %v716_v63, 0.0  ;;  %v3501_v62 = vor.u32 %v4029_v54, %v3500_v53  ;;  %v3977_v63 = vld [vmem:[#allocation6 + $0x31c] sm:$0xf]  ;;  %v3389_v53 = vor.u32 %v4001_v46, %v3388_v45  ;;  %v3194_v54 = vld [vmem:[#allocation6 + $0x254] sm:$0xf0] }
 0x158   :  { %2283 = vmatpush.bf16.msra.mxu3 %v3249_v60  ;;  %v673_v7 = vpop.f32.mrf.mxu2  ;;  %v4071_v60 = vld [vmem:[#allocation6 + $0x608] sm:$0xf0]  ;;  %v3949_v52 = vld [vmem:[#allocation6 + $0x23c] sm:$0xf]  ;;  %v3340_v22 = vld [vmem:[#allocation6 + $0x358] sm:$0xf] }
 0x159   :  { %v4309_v13 = vpack.c.bf16 %v725_v4, %v721_v3  ;;  %v674_v14 = vadd.f32 %v673_v7, %v280_v48  ;;  %v687_v18 = vpop.f32.mrf.mxu3  ;;  %v3529_v48 = vor.u32 %v4036_v39, %v3528_v38  ;;  %v4022_v3 = vld [vmem:[#allocation6 + $0x480] sm:$0xf0]  ;;  %v3669_v4 = vor.u32 %v4071_v60, %v3668_v58  ;;  %v3956_v38 = vld [vmem:[#allocation6 + $0x274] sm:$0xf]  ;;  %v3360_v58 = vld [vmem:[#allocation6 + $0x388] sm:$0xf] }
 0x15a   :  { %2268 = vmatpush.bf16.msra.mxu2 %v3053_v2  ;;  %v3472_v2 = vld [vmem:[#allocation6 + $0x468] sm:$0xf]  ;;  %v3309_v7 = vor.u32 %v3977_v63, %v3306_v0  ;;  %v3994_v60 = vld [vmem:[#allocation6 + $0x3a0] sm:$0xf0]  ;;  %v4040_v63 = vld [vmem:[#allocation6 + $0x514] sm:$0xf]  ;;  %v3197_v59 = vor.u32 %v3949_v52, %v3194_v54 }
 0x15b   :  { %v688_v20 = vadd.f32 %v687_v18, %v674_v14  ;;  %2204 = vmatmul.bf16.vlgmr.msrb.gmra.mxu1 %v4309_v13  ;;  %2232 = vmatmul.bf16.vlgmr.msrb.gmra.mxu3 %v4301_v25  ;;  %v3473_v12 = vor.u32 %v4022_v3, %v3472_v2  ;;  %v3970_v14 = vld [vmem:[#allocation6 + $0x2e4] sm:$0xf]  ;;  %v4015_v18 = vld [vmem:[#allocation6 + $0x448] sm:$0xf0]  ;;  %v3558_v0 = vld [vmem:[#allocation6 + $0x52c] sm:$0xf0]  ;;  %v3361_v3 = vor.u32 %v3994_v60, %v3360_v58 }
 0x15c   :  { %2284 = vmatpush.bf16.msra.mxu3 %v3221_v8  ;;  %2308 = vmatpush.bf16.msrb.mxu1 %v3781_v9  ;;  %v3640_v8 = vld [vmem:[#allocation6 + $0x5b8] sm:$0xf]  ;;  %v4064_v9 = vld [vmem:[#allocation6 + $0x5d0] sm:$0xf0]  ;;  %v3281_v21 = vor.u32 %v3970_v14, %v3278_v16  ;;  %v3942_v2 = vld [vmem:[#allocation6 + $0x204] sm:$0xf] }
 0x15d   :  { %v724_v30 = vmax.f32 %v688_v20, 0.0  ;;  %v3082_v20 = vld [vmem:[#allocation6 + $0x174] sm:$0xf0]  ;;  %v3988_v23 = vld [vmem:[#allocation6 + $0x370] sm:$0xf0] }
 0x15e   :  { %2269 = vmatpush.bf16.msra.mxu2 %v3025_v19  ;;  %v3641_v19 = vor.u32 %v4064_v9, %v3640_v8  ;;  %v3085_v28 = vor.u32 %v3921_v15, %v3082_v20  ;;  %v3561_v8 = vor.u32 %v4040_v63, %v3558_v0  ;;  %v3893_v9 = vld [vmem:[#allocation6 + $0x7c] sm:$0xf]  ;;  %v3530_v14 = vld [vmem:[#allocation6 + $0x4f4] sm:$0xf0]  ;;  %v3698_v15 = vld [vmem:[#allocation6 + $0x644] sm:$0xf0] }
 0x15f   :  { %v4313_v36 = vpack.c.bf16 %v724_v30, %v720_v29  ;;  %v3416_v29 = vld [vmem:[#allocation6 + $0x3f8] sm:$0xf]  ;;  %v4008_v30 = vld [vmem:[#allocation6 + $0x410] sm:$0xf0]  ;;  %v3284_v52 = vld [vmem:[#allocation6 + $0x2e8] sm:$0xf] }
 0x160   :  { %2285 = vmatpush.bf16.msra.mxu3 %v3193_v24  ;;  %2309 = vmatpush.bf16.msrb.mxu1 %v3753_v26  ;;  %v3445_v24 = vor.u32 %v4015_v18, %v3444_v17  ;;  %v3963_v26 = vld [vmem:[#allocation6 + $0x2ac] sm:$0xf]  ;;  %v3417_v39 = vor.u32 %v4008_v30, %v3416_v29  ;;  %v3138_v18 = vld [vmem:[#allocation6 + $0x1e4] sm:$0xf0]  ;;  %v3116_v45 = vld [vmem:[#allocation6 + $0x198] sm:$0xf] }
 0x161   :  { %2190 = vmatmul.bf16.vlgmr.msrb.gmra.mxu0 %v4313_v36  ;;  %2218 = vmatmul.bf16.vlgmr.msrb.gmra.mxu2 %v4305_v42  ;;  %v3935_v17 = vld [vmem:[#allocation6 + $0x1cc] sm:$0xf]  ;;  %v3932_v46 = vld [vmem:[#allocation6 + $0x1b0] sm:$0xf0]  ;;  %v3088_v58 = vld [vmem:[#allocation6 + $0x160] sm:$0xf] }
 0x162   :  { %2270 = vmatpush.bf16.msra.mxu2 %v2997_v33  ;;  %2294 = vmatpush.bf16.msrb.mxu0 %v3557_v34  ;;  %v3054_v33 = vld [vmem:[#allocation6 + $0x13c] sm:$0xf0]  ;;  %v3253_v34 = vor.u32 %v3963_v26, %v3250_v27  ;;  %v4026_v27 = vld [vmem:[#allocation6 + $0x4a4] sm:$0xf]  ;;  %v3141_v29 = vor.u32 %v3935_v17, %v3138_v18  ;;  %v3117_v54 = vor.u32 %v3932_v46, %v3116_v45  ;;  %v3925_v60 = vld [vmem:[#allocation6 + $0x178] sm:$0xf0] }
 0x163   :  { %v3057_v44 = vor.u32 %v3914_v32, %v3054_v33  ;;  %v2942_v26 = vld [vmem:[#allocation6 + $0x5c] sm:$0xf0]  ;;  %v4068_v32 = vld [vmem:[#allocation6 + $0x5f4] sm:$0xf]  ;;  %v3670_v33 = vld [vmem:[#allocation6 + $0x60c] sm:$0xf0] }
 0x164   :  { %2286 = vmatpush.bf16.msra.mxu3 %v3165_v40  ;;  %2310 = vmatpush.bf16.msrb.mxu1 %v3725_v41  ;;  %v3222_v40 = vld [vmem:[#allocation6 + $0x28c] sm:$0xf0]  ;;  %v4096_v41 = vld [vmem:[#allocation6 + $0x6d4] sm:$0xf]  ;;  %v3614_v63 = vld [vmem:[#allocation6 + $0x59c] sm:$0xf0] }
 0x165   :  { %v3225_v50 = vor.u32 %v3956_v38, %v3222_v40  ;;  %v3785_v51 = vor.u32 %v4096_v41, %v3782_v43  ;;  %v3981_v38 = vld [vmem:[#allocation6 + $0x338] sm:$0xf0]  ;;  %v2914_v40 = vld [vmem:[#allocation6 + $0x24] sm:$0xf0]  ;;  %v4019_v41 = vld [vmem:[#allocation6 + $0x46c] sm:$0xf] }
 0x166   :  { %2271 = vmatpush.bf16.msra.mxu2 %v2969_v47  ;;  %2295 = vmatpush.bf16.msrb.mxu0 %v3529_v48  ;;  %v3585_v47 = vor.u32 %v4050_v37, %v3584_v35  ;;  %v3907_v48 = vld [vmem:[#allocation6 + $0xec] sm:$0xf]  ;;  %v3312_v37 = vld [vmem:[#allocation6 + $0x320] sm:$0xf]  ;;  %v3474_v43 = vld [vmem:[#allocation6 + $0x484] sm:$0xf0] }
 0x167   :  { %v4100_v17 = vld [vmem:[#allocation6 + $0x6f0] sm:$0xf0] }
 0x168   :  { %2287 = vmatpush.bf16.msra.mxu3 %v3137_v55  ;;  %2311 = vmatpush.bf16.msrb.mxu1 %v3697_v56  ;;  %v4089_v55 = vld [vmem:[#allocation6 + $0x69c] sm:$0xf]  ;;  %v3754_v56 = vld [vmem:[#allocation6 + $0x6b4] sm:$0xf0] }
 0x169   :  { %v3757_v1 = vor.u32 %v4089_v55, %v3754_v56  ;;  %v4012_v55 = vld [vmem:[#allocation6 + $0x434] sm:$0xf]  ;;  %v3446_v56 = vld [vmem:[#allocation6 + $0x44c] sm:$0xf0] }
 0x16a   :  { %2272 = vmatpush.bf16.msra.mxu2 %v2941_v61  ;;  %2296 = vmatpush.bf16.msrb.mxu0 %v3501_v62  ;;  %v3900_v61 = vld [vmem:[#allocation6 + $0xb4] sm:$0xf]  ;;  %v2998_v62 = vld [vmem:[#allocation6 + $0xcc] sm:$0xf0]  ;;  %v3449_v0 = vor.u32 %v4012_v55, %v3446_v56  ;;  %v3939_v56 = vld [vmem:[#allocation6 + $0x1e8] sm:$0xf0] }
 0x16b   :  { %2260 = vmatmul.bf16.vlgmr.msra.gmra.mxu1 %v4309_v13  ;;  %2288 = vmatmul.bf16.vlgmr.msra.gmra.mxu3 %v4301_v25 }
 0x16c   :  { %2336 = vmatpush.bf16.msrb.mxu3 %v3337_v57  ;;  %2312 = vmatpush.bf16.msrb.mxu1 %v3669_v4  ;;  %v3029_v57 = vor.u32 %v3907_v48, %v3026_v49  ;;  %v3166_v4 = vld [vmem:[#allocation6 + $0x21c] sm:$0xf0]  ;;  %v4061_v48 = vld [vmem:[#allocation6 + $0x5bc] sm:$0xf]  ;;  %v3642_v49 = vld [vmem:[#allocation6 + $0x5d4] sm:$0xf0] }
 0x16d   :  { %v3169_v16 = vor.u32 %v3942_v2, %v3166_v4  ;;  %v3089_v2 = vor.u32 %v3925_v60, %v3088_v58  ;;  %v3418_v4 = vld [vmem:[#allocation6 + $0x414] sm:$0xf0]  ;;  %v4079_v58 = vld [vmem:[#allocation6 + $0x648] sm:$0xf0] }
 0x16e   :  { %2273 = vmatpush.bf16.msra.mxu2 %v2913_v11  ;;  %2297 = vmatpush.bf16.msrb.mxu0 %v3473_v12  ;;  %v2970_v11 = vld [vmem:[#allocation6 + $0x94] sm:$0xf0]  ;;  %v4033_v12 = vld [vmem:[#allocation6 + $0x4dc] sm:$0xf] }
 0x16f   :  { %v2973_v20 = vor.u32 %v3893_v9, %v2970_v11  ;;  %v4047_v9 = vld [vmem:[#allocation6 + $0x54c] sm:$0xf]  ;;  %v3586_v11 = vld [vmem:[#allocation6 + $0x564] sm:$0xf0] }
 0x170   :  { %2337 = vmatpush.bf16.msrb.mxu3 %v3309_v7  ;;  %2313 = vmatpush.bf16.msrb.mxu1 %v3641_v19  ;;  %v3001_v7 = vor.u32 %v3900_v61, %v2998_v62  ;;  %v4075_v19 = vld [vmem:[#allocation6 + $0x62c] sm:$0xf]  ;;  %v4054_v62 = vld [vmem:[#allocation6 + $0x584] sm:$0xf] }
 0x171   :  { %2246 = vmatmul.bf16.vlgmr.msra.gmra.mxu0 %v4313_v36  ;;  %2274 = vmatmul.bf16.vlgmr.msra.gmra.mxu2 %v4305_v42  ;;  %v3701_v30 = vor.u32 %v4075_v19, %v3698_v15  ;;  %v3998_v19 = vld [vmem:[#allocation6 + $0x3c4] sm:$0xf]  ;;  %v3390_v15 = vld [vmem:[#allocation6 + $0x3dc] sm:$0xf0] }
 0x172   :  { %2322 = vmatpush.bf16.msrb.mxu2 %v3113_v10  ;;  %2298 = vmatpush.bf16.msrb.mxu0 %v3445_v24  ;;  %v3729_v10 = vor.u32 %v4082_v5, %v3726_v6  ;;  %v3886_v24 = vld [vmem:[#allocation6 + $0x44] sm:$0xf]  ;;  %v3617_v5 = vor.u32 %v4054_v62, %v3614_v63  ;;  %v3060_v6 = vld [vmem:[#allocation6 + $0x128] sm:$0xf]  ;;  %v3985_v62 = vld [vmem:[#allocation6 + $0x35c] sm:$0xf] }
 0x173   :  { %v3342_v63 = vld [vmem:[#allocation6 + $0x374] sm:$0xf0] }
 0x174   :  { %2338 = vmatpush.bf16.msrb.mxu3 %v3281_v21  ;;  %2314 = vmatpush.bf16.msrb.mxu1 %v3613_v31  ;;  %v3533_v21 = vor.u32 %v4033_v12, %v3530_v14  ;;  %v3341_v31 = vor.u32 %v3988_v23, %v3340_v22  ;;  %v3228_v12 = vld [vmem:[#allocation6 + $0x278] sm:$0xf]  ;;  %v3911_v22 = vld [vmem:[#allocation6 + $0x108] sm:$0xf0] }
 0x176   :  { %2323 = vmatpush.bf16.msrb.mxu2 %v3085_v28  ;;  %2299 = vmatpush.bf16.msrb.mxu0 %v3417_v39  ;;  %v3502_v28 = vld [vmem:[#allocation6 + $0x4bc] sm:$0xf0]  ;;  %v3879_v39 = vld [vmem:[#allocation6 + $0xc] sm:$0xf] }
 0x177   :  { %v3505_v35 = vor.u32 %v4026_v27, %v3502_v28  ;;  %v3393_v27 = vor.u32 %v3998_v19, %v3390_v15  ;;  %v3953_v28 = vld [vmem:[#allocation6 + $0x258] sm:$0xf0]  ;;  %v3118_v19 = vld [vmem:[#allocation6 + $0x1b4] sm:$0xf0] }
 0x178   :  { %2339 = vmatpush.bf16.msrb.mxu3 %v3253_v34  ;;  %2315 = vmatpush.bf16.msrb.mxu1 %v3585_v47  ;;  %v2945_v34 = vor.u32 %v3886_v24, %v2942_v26  ;;  %v3313_v47 = vor.u32 %v3981_v38, %v3312_v37  ;;  %v3200_v26 = vld [vmem:[#allocation6 + $0x240] sm:$0xf]  ;;  %v3564_v37 = vld [vmem:[#allocation6 + $0x518] sm:$0xf]  ;;  %v4044_v38 = vld [vmem:[#allocation6 + $0x530] sm:$0xf0] }
 0x179   :  { %v3565_v46 = vor.u32 %v4044_v38, %v3564_v37  ;;  %v3620_v37 = vld [vmem:[#allocation6 + $0x588] sm:$0xf]  ;;  %v4058_v38 = vld [vmem:[#allocation6 + $0x5a0] sm:$0xf0] }
 0x17a   :  { %2324 = vmatpush.bf16.msrb.mxu2 %v3057_v44  ;;  %2300 = vmatpush.bf16.msrb.mxu0 %v3389_v53  ;;  %v3673_v44 = vor.u32 %v4068_v32, %v3670_v33  ;;  %v3974_v53 = vld [vmem:[#allocation6 + $0x300] sm:$0xf0]  ;;  %v3991_v32 = vld [vmem:[#allocation6 + $0x38c] sm:$0xf]  ;;  %v3362_v33 = vld [vmem:[#allocation6 + $0x3a4] sm:$0xf0] }
 0x17b   :  { %2316 = vmatmul.bf16.vlgmr.msrb.gmra.mxu1 %v4309_v13  ;;  %v3285_v61 = vor.u32 %v3974_v53, %v3284_v52  ;;  %v4037_v52 = vld [vmem:[#allocation6 + $0x4f8] sm:$0xf0] }
 0x17c   :  { %2340 = vmatpush.bf16.msrb.mxu3 %v3225_v50  ;;  %2364 = vmatpush.bf16.msra.mxu1 %v3785_v51  ;;  %v2917_v50 = vor.u32 %v3879_v39, %v2914_v40  ;;  %v3477_v51 = vor.u32 %v4019_v41, %v3474_v43  ;;  %v3201_v39 = vor.u32 %v3953_v28, %v3200_v26  ;;  %v3172_v43 = vld [vmem:[#allocation6 + $0x208] sm:$0xf]  ;;  %v3971_v26 = vld [vmem:[#allocation6 + $0x2ec] sm:$0xf] }
 0x17d   :  { %v3365_v41 = vor.u32 %v3991_v32, %v3362_v33  ;;  %v3286_v28 = vld [vmem:[#allocation6 + $0x304] sm:$0xf0]  ;;  %v3090_v32 = vld [vmem:[#allocation6 + $0x17c] sm:$0xf0] }
 0x17e   :  { %2325 = vmatpush.bf16.msrb.mxu2 %v3029_v57  ;;  %2301 = vmatpush.bf16.msrb.mxu0 %v3361_v3  ;;  %v3645_v57 = vor.u32 %v4061_v48, %v3642_v49  ;;  %v4005_v3 = vld [vmem:[#allocation6 + $0x3fc] sm:$0xf]  ;;  %v4086_v48 = vld [vmem:[#allocation6 + $0x680] sm:$0xf0]  ;;  %v2976_v49 = vld [vmem:[#allocation6 + $0x80] sm:$0xf] }
 0x17f   :  { %v3421_v14 = vor.u32 %v4005_v3, %v3418_v4 }
 0x180   :  { %2341 = vmatpush.bf16.msrb.mxu3 %v3197_v59  ;;  %2365 = vmatpush.bf16.msra.mxu1 %v3757_v1  ;;  %v3256_v59 = vld [vmem:[#allocation6 + $0x2b0] sm:$0xf]  ;;  %v3967_v1 = vld [vmem:[#allocation6 + $0x2c8] sm:$0xf0] }
 0x181   :  { %2302 = vmatmul.bf16.vlgmr.msrb.gmra.mxu0 %v4313_v36 }
 0x182   :  { %2326 = vmatpush.bf16.msrb.mxu2 %v3001_v7  ;;  %2350 = vmatpush.bf16.msra.mxu0 %v3561_v8  ;;  %v3918_v7 = vld [vmem:[#allocation6 + $0x140] sm:$0xf0]  ;;  %v3257_v8 = vor.u32 %v3967_v1, %v3256_v59  ;;  %v3508_v1 = vld [vmem:[#allocation6 + $0x4a8] sm:$0xf] }
 0x183   :  { %v3061_v18 = vor.u32 %v3918_v7, %v3060_v6  ;;  %v3890_v59 = vld [vmem:[#allocation6 + $0x60] sm:$0xf0]  ;;  %v3676_v6 = vld [vmem:[#allocation6 + $0x5f8] sm:$0xf]  ;;  %v4072_v7 = vld [vmem:[#allocation6 + $0x610] sm:$0xf0] }
 0x184   :  { %2342 = vmatpush.bf16.msrb.mxu3 %v3169_v16  ;;  %2366 = vmatpush.bf16.msra.mxu1 %v3729_v10  ;;  %v3960_v16 = vld [vmem:[#allocation6 + $0x290] sm:$0xf0]  ;;  %v3788_v10 = vld [vmem:[#allocation6 + $0x6d8] sm:$0xf]  ;;  %v3677_v15 = vor.u32 %v4072_v7, %v3676_v6  ;;  %v3368_v6 = vld [vmem:[#allocation6 + $0x390] sm:$0xf] }
 0x185   :  { %v3229_v23 = vor.u32 %v3960_v16, %v3228_v12  ;;  %v3789_v24 = vor.u32 %v4100_v17, %v3788_v10  ;;  %v3314_v12 = vld [vmem:[#allocation6 + $0x33c] sm:$0xf0]  ;;  %v3883_v16 = vld [vmem:[#allocation6 + $0x28] sm:$0xf0]  ;;  %v3480_v10 = vld [vmem:[#allocation6 + $0x470] sm:$0xf] }
 0x186   :  { %2327 = vmatpush.bf16.msrb.mxu2 %v2973_v20  ;;  %2351 = vmatpush.bf16.msra.mxu0 %v3533_v21  ;;  %v3589_v20 = vor.u32 %v4047_v9, %v3586_v11  ;;  %v3032_v21 = vld [vmem:[#allocation6 + $0xf0] sm:$0xf]  ;;  %v3978_v11 = vld [vmem:[#allocation6 + $0x324] sm:$0xf]  ;;  %v4023_v17 = vld [vmem:[#allocation6 + $0x488] sm:$0xf0] }
 0x187   :  { %v3995_v7 = vld [vmem:[#allocation6 + $0x3a8] sm:$0xf0] }
 0x188   :  { %2343 = vmatpush.bf16.msrb.mxu3 %v3141_v29  ;;  %2367 = vmatpush.bf16.msra.mxu1 %v3701_v30  ;;  %v3760_v29 = vld [vmem:[#allocation6 + $0x6a0] sm:$0xf]  ;;  %v4093_v30 = vld [vmem:[#allocation6 + $0x6b8] sm:$0xf0] }
 0x189   :  { %v3761_v40 = vor.u32 %v4093_v30, %v3760_v29  ;;  %v3452_v29 = vld [vmem:[#allocation6 + $0x438] sm:$0xf]  ;;  %v4016_v30 = vld [vmem:[#allocation6 + $0x450] sm:$0xf0] }
 0x18a   :  { %2328 = vmatpush.bf16.msrb.mxu2 %v2945_v34  ;;  %2352 = vmatpush.bf16.msra.mxu0 %v3505_v35  ;;  %v3004_v34 = vld [vmem:[#allocation6 + $0xb8] sm:$0xf]  ;;  %v3904_v35 = vld [vmem:[#allocation6 + $0xd0] sm:$0xf0] }
 0x18b   :  { %2344 = vmatmul.bf16.vlgmr.msrb.gmra.mxu3 %v4301_v25  ;;  %v3005_v45 = vor.u32 %v3904_v35, %v3004_v34  ;;  %v3289_v34 = vor.u32 %v3971_v26, %v3286_v28  ;;  %v3453_v35 = vor.u32 %v4016_v30, %v3452_v29  ;;  %v3538_v26 = vld [vmem:[#allocation6 + $0x4fc] sm:$0xf0]  ;;  %v3936_v28 = vld [vmem:[#allocation6 + $0x1d4] sm:$0xf] }
 0x18c   :  { %2392 = vmatpush.bf16.msra.mxu3 %v3341_v31  ;;  %2368 = vmatpush.bf16.msra.mxu1 %v3673_v44  ;;  %v3033_v31 = vor.u32 %v3911_v22, %v3032_v21  ;;  %v3946_v44 = vld [vmem:[#allocation6 + $0x220] sm:$0xf0]  ;;  %v3481_v22 = vor.u32 %v4023_v17, %v3480_v10  ;;  %v3369_v10 = vor.u32 %v3995_v7, %v3368_v6 }
 0x18d   :  { %v3173_v53 = vor.u32 %v3946_v44, %v3172_v43  ;;  %v3424_v43 = vld [vmem:[#allocation6 + $0x400] sm:$0xf]  ;;  %v4009_v44 = vld [vmem:[#allocation6 + $0x418] sm:$0xf0]  ;;  %v3926_v6 = vld [vmem:[#allocation6 + $0x180] sm:$0xf0] }
 0x18e   :  { %2329 = vmatpush.bf16.msrb.mxu2 %v2917_v50  ;;  %2353 = vmatpush.bf16.msra.mxu0 %v3477_v51  ;;  %v3897_v50 = vld [vmem:[#allocation6 + $0x98] sm:$0xf0]  ;;  %v3536_v51 = vld [vmem:[#allocation6 + $0x4e0] sm:$0xf] }
 0x18f   :  { %v2977_v60 = vor.u32 %v3897_v50, %v2976_v49  ;;  %v3425_v50 = vor.u32 %v4009_v44, %v3424_v43 }
 0x190   :  { %2393 = vmatpush.bf16.msra.mxu3 %v3313_v47  ;;  %2369 = vmatpush.bf16.msra.mxu1 %v3645_v57  ;;  %v3732_v47 = vld [vmem:[#allocation6 + $0x668] sm:$0xf]  ;;  %v3704_v57 = vld [vmem:[#allocation6 + $0x630] sm:$0xf] }
 0x191   :  { %2330 = vmatmul.bf16.vlgmr.msrb.gmra.mxu2 %v4305_v42  ;;  %v3733_v55 = vor.u32 %v4086_v48, %v3732_v47  ;;  %v3705_v4 = vor.u32 %v4079_v58, %v3704_v57  ;;  %v3621_v47 = vor.u32 %v4058_v38, %v3620_v37  ;;  %v3592_v48 = vld [vmem:[#allocation6 + $0x550] sm:$0xf]  ;;  %v3396_v57 = vld [vmem:[#allocation6 + $0x3c8] sm:$0xf]  ;;  %v4002_v58 = vld [vmem:[#allocation6 + $0x3e0] sm:$0xf0] }
 0x192   :  { %2378 = vmatpush.bf16.msra.mxu2 %v3117_v54  ;;  %2354 = vmatpush.bf16.msra.mxu0 %v3449_v0  ;;  %v3144_v54 = vld [vmem:[#allocation6 + $0x1d0] sm:$0xf]  ;;  %v2948_v0 = vld [vmem:[#allocation6 + $0x48] sm:$0xf]  ;;  %v3989_v37 = vld [vmem:[#allocation6 + $0x378] sm:$0xf0] }
 0x193   :  { %v3145_v3 = vor.u32 %v3939_v56, %v3144_v54  ;;  %v3790_v56 = vld [vmem:[#allocation6 + $0x6f4] sm:$0xf0]  ;;  %v3887_v38 = vld [vmem:[#allocation6 + $0x4c] sm:$0xf] }
 0x194   :  { %2394 = vmatpush.bf16.msra.mxu3 %v3285_v61  ;;  %2370 = vmatpush.bf16.msra.mxu1 %v3617_v5  ;;  %v3537_v61 = vor.u32 %v4037_v52, %v3536_v51  ;;  %v3345_v5 = vor.u32 %v3985_v62, %v3342_v63  ;;  %v4051_v51 = vld [vmem:[#allocation6 + $0x568] sm:$0xf0]  ;;  %v3957_v52 = vld [vmem:[#allocation6 + $0x27c] sm:$0xf] }
 0x195   :  { %v3593_v62 = vor.u32 %v4051_v51, %v3592_v48  ;;  %v3982_v51 = vld [vmem:[#allocation6 + $0x340] sm:$0xf0] }
 0x196   :  { %2379 = vmatpush.bf16.msra.mxu2 %v3089_v2  ;;  %2355 = vmatpush.bf16.msra.mxu0 %v3421_v14  ;;  %v4030_v2 = vld [vmem:[#allocation6 + $0x4c0] sm:$0xf0]  ;;  %v2920_v14 = vld [vmem:[#allocation6 + $0x10] sm:$0xf] }
 0x197   :  { %v3509_v9 = vor.u32 %v4030_v2, %v3508_v1  ;;  %v2921_v21 = vor.u32 %v3883_v16, %v2920_v14  ;;  %v3202_v1 = vld [vmem:[#allocation6 + $0x25c] sm:$0xf0]  ;;  %v3397_v2 = vor.u32 %v4002_v58, %v3396_v57  ;;  %v3933_v57 = vld [vmem:[#allocation6 + $0x1b8] sm:$0xf0] }
 0x198   :  { %2395 = vmatpush.bf16.msra.mxu3 %v3257_v8  ;;  %2371 = vmatpush.bf16.msra.mxu1 %v3589_v20  ;;  %v2949_v8 = vor.u32 %v3890_v59, %v2948_v0  ;;  %v3317_v20 = vor.u32 %v3978_v11, %v3314_v12  ;;  %v3950_v59 = vld [vmem:[#allocation6 + $0x244] sm:$0xf]  ;;  %v4041_v11 = vld [vmem:[#allocation6 + $0x51c] sm:$0xf]  ;;  %v3566_v12 = vld [vmem:[#allocation6 + $0x534] sm:$0xf0] }
 0x199   :  { %v3205_v14 = vor.u32 %v3950_v59, %v3202_v1  ;;  %v3292_v59 = vld [vmem:[#allocation6 + $0x2f0] sm:$0xf] }
 0x19a   :  { %2380 = vmatpush.bf16.msra.mxu2 %v3061_v18  ;;  %2356 = vmatpush.bf16.msra.mxu0 %v3393_v27  ;;  %v3929_v18 = vld [vmem:[#allocation6 + $0x19c] sm:$0xf] }
 0x19b   :  { %2372 = vmatmul.bf16.vlgmr.msra.gmra.mxu1 %v4309_v13  ;;  %v3121_v27 = vor.u32 %v3929_v18, %v3118_v19  ;;  %v3943_v18 = vld [vmem:[#allocation6 + $0x20c] sm:$0xf]  ;;  %v3174_v19 = vld [vmem:[#allocation6 + $0x224] sm:$0xf0] }
 0x19c   :  { %2396 = vmatpush.bf16.msra.mxu3 %v3229_v23  ;;  %2420 = vmatpush.bf16.msrb.mxu1 %v3789_v24  ;;  %v3648_v23 = vld [vmem:[#allocation6 + $0x5c0] sm:$0xf]  ;;  %v4065_v24 = vld [vmem:[#allocation6 + $0x5d8] sm:$0xf0] }
 0x19d   :  { %v3649_v33 = vor.u32 %v4065_v24, %v3648_v23  ;;  %v2978_v23 = vld [vmem:[#allocation6 + $0x9c] sm:$0xf0]  ;;  %v4034_v24 = vld [vmem:[#allocation6 + $0x4e4] sm:$0xf] }
 0x19e   :  { %2381 = vmatpush.bf16.msra.mxu2 %v3033_v31  ;;  %2357 = vmatpush.bf16.msra.mxu0 %v3365_v41  ;;  %v3922_v31 = vld [vmem:[#allocation6 + $0x164] sm:$0xf]  ;;  %v3258_v41 = vld [vmem:[#allocation6 + $0x2cc] sm:$0xf0] }
 0x1a0   :  { %2397 = vmatpush.bf16.msra.mxu3 %v3201_v39  ;;  %2421 = vmatpush.bf16.msrb.mxu1 %v3761_v40  ;;  %v3964_v39 = vld [vmem:[#allocation6 + $0x2b4] sm:$0xf]  ;;  %v3093_v40 = vor.u32 %v3922_v31, %v3090_v32  ;;  %v3146_v31 = vld [vmem:[#allocation6 + $0x1ec] sm:$0xf0] }
 0x1a1   :  { %2358 = vmatmul.bf16.vlgmr.msra.gmra.mxu0 %v4313_v36  ;;  %v3261_v49 = vor.u32 %v3964_v39, %v3258_v41  ;;  %v4076_v32 = vld [vmem:[#allocation6 + $0x634] sm:$0xf]  ;;  %v2950_v39 = vld [vmem:[#allocation6 + $0x64] sm:$0xf0]  ;;  %v3149_v43 = vor.u32 %v3936_v28, %v3146_v31  ;;  %v3999_v31 = vld [vmem:[#allocation6 + $0x3cc] sm:$0xf] }
 0x1a2   :  { %2382 = vmatpush.bf16.msra.mxu2 %v3005_v45  ;;  %2406 = vmatpush.bf16.msrb.mxu0 %v3565_v46  ;;  %v3915_v45 = vld [vmem:[#allocation6 + $0x12c] sm:$0xf]  ;;  %v3062_v46 = vld [vmem:[#allocation6 + $0x144] sm:$0xf0]  ;;  %v2953_v48 = vor.u32 %v3887_v38, %v2950_v39 }
 0x1a3   :  { %v3065_v54 = vor.u32 %v3915_v45, %v3062_v46  ;;  %v3510_v41 = vld [vmem:[#allocation6 + $0x4c4] sm:$0xf0]  ;;  %v4069_v46 = vld [vmem:[#allocation6 + $0x5fc] sm:$0xf] }
 0x1a4   :  { %2398 = vmatpush.bf16.msra.mxu3 %v3173_v53  ;;  %2422 = vmatpush.bf16.msrb.mxu1 %v3733_v55  ;;  %v3230_v53 = vld [vmem:[#allocation6 + $0x294] sm:$0xf0]  ;;  %v4097_v55 = vld [vmem:[#allocation6 + $0x6dc] sm:$0xf]  ;;  %v3208_v39 = vld [vmem:[#allocation6 + $0x248] sm:$0xf] }
 0x1a5   :  { %v3233_v63 = vor.u32 %v3957_v52, %v3230_v53  ;;  %v3793_v0 = vor.u32 %v4097_v55, %v3790_v56  ;;  %v3880_v52 = vld [vmem:[#allocation6 + $0x14] sm:$0xf]  ;;  %v2922_v53 = vld [vmem:[#allocation6 + $0x2c] sm:$0xf0]  ;;  %v3124_v56 = vld [vmem:[#allocation6 + $0x1a0] sm:$0xf] }
 0x1a6   :  { %2383 = vmatpush.bf16.msra.mxu2 %v2977_v60  ;;  %2407 = vmatpush.bf16.msrb.mxu0 %v3537_v61  ;;  %v3908_v60 = vld [vmem:[#allocation6 + $0xf4] sm:$0xf]  ;;  %v3034_v61 = vld [vmem:[#allocation6 + $0x10c] sm:$0xf0]  ;;  %v3125_v1 = vor.u32 %v3933_v57, %v3124_v56  ;;  %v3947_v57 = vld [vmem:[#allocation6 + $0x228] sm:$0xf0] }
 0x1a7   :  { %v3482_v55 = vld [vmem:[#allocation6 + $0x48c] sm:$0xf0] }
 0x1a8   :  { %2399 = vmatpush.bf16.msra.mxu3 %v3145_v3  ;;  %2423 = vmatpush.bf16.msrb.mxu1 %v3705_v4  ;;  %v3037_v3 = vor.u32 %v3908_v60, %v3034_v61  ;;  %v4090_v4 = vld [vmem:[#allocation6 + $0x6a4] sm:$0xf]  ;;  %v2925_v61 = vor.u32 %v3880_v52, %v2922_v53  ;;  %v3180_v56 = vld [vmem:[#allocation6 + $0x210] sm:$0xf] }
 0x1aa   :  { %2384 = vmatpush.bf16.msra.mxu2 %v2949_v8  ;;  %2408 = vmatpush.bf16.msrb.mxu0 %v3509_v9  ;;  %v3901_v8 = vld [vmem:[#allocation6 + $0xbc] sm:$0xf]  ;;  %v3006_v9 = vld [vmem:[#allocation6 + $0xd4] sm:$0xf0] }
 0x1ab   :  { %2400 = vmatmul.bf16.vlgmr.msra.gmra.mxu3 %v4301_v25  ;;  %v3009_v17 = vor.u32 %v3901_v8, %v3006_v9 }
 0x1ac   :  { %2448 = vmatpush.bf16.msrb.mxu3 %v3345_v5  ;;  %2424 = vmatpush.bf16.msrb.mxu1 %v3677_v15  ;;  %v3762_v5 = vld [vmem:[#allocation6 + $0x6bc] sm:$0xf0]  ;;  %v4083_v15 = vld [vmem:[#allocation6 + $0x66c] sm:$0xf] }
 0x1ad   :  { %v3765_v16 = vor.u32 %v4090_v4, %v3762_v5  ;;  %v3454_v4 = vld [vmem:[#allocation6 + $0x454] sm:$0xf0]  ;;  %v3096_v5 = vld [vmem:[#allocation6 + $0x168] sm:$0xf] }
 0x1ae   :  { %2385 = vmatpush.bf16.msra.mxu2 %v2921_v21  ;;  %2409 = vmatpush.bf16.msrb.mxu0 %v3481_v22  ;;  %v3734_v21 = vld [vmem:[#allocation6 + $0x684] sm:$0xf0]  ;;  %v3894_v22 = vld [vmem:[#allocation6 + $0x84] sm:$0xf] }
 0x1af   :  { %v3737_v29 = vor.u32 %v4083_v15, %v3734_v21  ;;  %v2981_v30 = vor.u32 %v3894_v22, %v2978_v23  ;;  %v3919_v15 = vld [vmem:[#allocation6 + $0x148] sm:$0xf0]  ;;  %v4048_v21 = vld [vmem:[#allocation6 + $0x554] sm:$0xf] }
 0x1b0   :  { %2449 = vmatpush.bf16.msrb.mxu3 %v3317_v20  ;;  %2425 = vmatpush.bf16.msrb.mxu1 %v3649_v33  ;;  %v3569_v20 = vor.u32 %v4041_v11, %v3566_v12  ;;  %v3706_v33 = vld [vmem:[#allocation6 + $0x64c] sm:$0xf0]  ;;  %v4055_v11 = vld [vmem:[#allocation6 + $0x58c] sm:$0xf]  ;;  %v3622_v12 = vld [vmem:[#allocation6 + $0x5a4] sm:$0xf0] }
 0x1b1   :  { %2386 = vmatmul.bf16.vlgmr.msra.gmra.mxu2 %v4305_v42  ;;  %v3709_v44 = vor.u32 %v4076_v32, %v3706_v33  ;;  %v3398_v32 = vld [vmem:[#allocation6 + $0x3e4] sm:$0xf0]  ;;  %v3040_v33 = vld [vmem:[#allocation6 + $0xf8] sm:$0xf] }
 0x1b2   :  { %2434 = vmatpush.bf16.msrb.mxu2 %v3121_v27  ;;  %2410 = vmatpush.bf16.msrb.mxu0 %v3453_v35  ;;  %v3177_v27 = vor.u32 %v3943_v18, %v3174_v19  ;;  %v3348_v35 = vld [vmem:[#allocation6 + $0x360] sm:$0xf]  ;;  %v3068_v19 = vld [vmem:[#allocation6 + $0x130] sm:$0xf] }
 0x1b3   :  { %v3349_v45 = vor.u32 %v3989_v37, %v3348_v35  ;;  %v3426_v18 = vld [vmem:[#allocation6 + $0x41c] sm:$0xf0]  ;;  %v3069_v28 = vor.u32 %v3919_v15, %v3068_v19 }
 0x1b4   :  { %2450 = vmatpush.bf16.msrb.mxu3 %v3289_v34  ;;  %2426 = vmatpush.bf16.msrb.mxu1 %v3621_v47  ;;  %v3541_v34 = vor.u32 %v4034_v24, %v3538_v26  ;;  %v3678_v47 = vld [vmem:[#allocation6 + $0x614] sm:$0xf0]  ;;  %v3594_v24 = vld [vmem:[#allocation6 + $0x56c] sm:$0xf0]  ;;  %v3236_v26 = vld [vmem:[#allocation6 + $0x280] sm:$0xf] }
 0x1b5   :  { %v3681_v58 = vor.u32 %v4069_v46, %v3678_v47  ;;  %v3597_v35 = vor.u32 %v4048_v21, %v3594_v24  ;;  %v3992_v46 = vld [vmem:[#allocation6 + $0x394] sm:$0xf]  ;;  %v3370_v47 = vld [vmem:[#allocation6 + $0x3ac] sm:$0xf0]  ;;  %v2928_v24 = vld [vmem:[#allocation6 + $0x18] sm:$0xf] }
 0x1b6   :  { %2435 = vmatpush.bf16.msrb.mxu2 %v3093_v40  ;;  %2411 = vmatpush.bf16.msrb.mxu0 %v3425_v50  ;;  %v4027_v40 = vld [vmem:[#allocation6 + $0x4ac] sm:$0xf]  ;;  %v3320_v50 = vld [vmem:[#allocation6 + $0x328] sm:$0xf] }
 0x1b7   :  { %v3321_v60 = vor.u32 %v3982_v51, %v3320_v50  ;;  %v3572_v50 = vld [vmem:[#allocation6 + $0x520] sm:$0xf]  ;;  %v4045_v51 = vld [vmem:[#allocation6 + $0x538] sm:$0xf0] }
 0x1b8   :  { %2451 = vmatpush.bf16.msrb.mxu3 %v3261_v49  ;;  %2427 = vmatpush.bf16.msrb.mxu1 %v3593_v62  ;;  %v3513_v49 = vor.u32 %v4027_v40, %v3510_v41  ;;  %v3954_v40 = vld [vmem:[#allocation6 + $0x260] sm:$0xf0]  ;;  %v3401_v41 = vor.u32 %v3999_v31, %v3398_v32 }
 0x1b9   :  { %v3209_v52 = vor.u32 %v3954_v40, %v3208_v39  ;;  %v3460_v39 = vld [vmem:[#allocation6 + $0x440] sm:$0xf]  ;;  %v4017_v40 = vld [vmem:[#allocation6 + $0x458] sm:$0xf0] }
 0x1ba   :  { %2436 = vmatpush.bf16.msrb.mxu2 %v3065_v54  ;;  %2412 = vmatpush.bf16.msrb.mxu0 %v3397_v2  ;;  %v4020_v54 = vld [vmem:[#allocation6 + $0x474] sm:$0xf]  ;;  %v3975_v2 = vld [vmem:[#allocation6 + $0x308] sm:$0xf0] }
 0x1bb   :  { %2428 = vmatmul.bf16.vlgmr.msrb.gmra.mxu1 %v4309_v13  ;;  %v3485_v62 = vor.u32 %v4020_v54, %v3482_v55  ;;  %v3293_v8 = vor.u32 %v3975_v2, %v3292_v59  ;;  %v3373_v54 = vor.u32 %v3992_v46, %v3370_v47  ;;  %v3544_v59 = vld [vmem:[#allocation6 + $0x4e8] sm:$0xf]  ;;  %v3461_v46 = vor.u32 %v4017_v40, %v3460_v39  ;;  %v3628_v47 = vld [vmem:[#allocation6 + $0x590] sm:$0xf] }
 0x1bc   :  { %2452 = vmatpush.bf16.msrb.mxu3 %v3233_v63  ;;  %2476 = vmatpush.bf16.msra.mxu1 %v3793_v0  ;;  %v4062_v63 = vld [vmem:[#allocation6 + $0x5c4] sm:$0xf]  ;;  %v3650_v0 = vld [vmem:[#allocation6 + $0x5dc] sm:$0xf0] }
 0x1bd   :  { %v3653_v7 = vor.u32 %v4062_v63, %v3650_v0  ;;  %v2984_v63 = vld [vmem:[#allocation6 + $0x88] sm:$0xf]  ;;  %v3898_v0 = vld [vmem:[#allocation6 + $0xa0] sm:$0xf0] }
 0x1be   :  { %2437 = vmatpush.bf16.msrb.mxu2 %v3037_v3  ;;  %2413 = vmatpush.bf16.msrb.mxu0 %v3369_v10  ;;  %v4013_v3 = vld [vmem:[#allocation6 + $0x43c] sm:$0xf]  ;;  %v3968_v10 = vld [vmem:[#allocation6 + $0x2d0] sm:$0xf0] }
 0x1bf   :  { %v3457_v9 = vor.u32 %v4013_v3, %v3454_v4  ;;  %v3181_v3 = vor.u32 %v3947_v57, %v3180_v56  ;;  %v4052_v56 = vld [vmem:[#allocation6 + $0x570] sm:$0xf0] }
 0x1c0   :  { %2453 = vmatpush.bf16.msrb.mxu3 %v3205_v14  ;;  %2477 = vmatpush.bf16.msra.mxu1 %v3765_v16  ;;  %v3264_v14 = vld [vmem:[#allocation6 + $0x2b8] sm:$0xf]  ;;  %v3097_v16 = vor.u32 %v3926_v6, %v3096_v5  ;;  %v2985_v5 = vor.u32 %v3898_v0, %v2984_v63 }
 0x1c1   :  { %2414 = vmatmul.bf16.vlgmr.msrb.gmra.mxu0 %v4313_v36  ;;  %v3265_v22 = vor.u32 %v3968_v10, %v3264_v14  ;;  %v3152_v6 = vld [vmem:[#allocation6 + $0x1d8] sm:$0xf]  ;;  %v3891_v14 = vld [vmem:[#allocation6 + $0x68] sm:$0xf0]  ;;  %v3516_v10 = vld [vmem:[#allocation6 + $0x4b0] sm:$0xf] }
 0x1c2   :  { %2438 = vmatpush.bf16.msrb.mxu2 %v3009_v17  ;;  %2462 = vmatpush.bf16.msra.mxu0 %v3569_v20  ;;  %v4006_v17 = vld [vmem:[#allocation6 + $0x404] sm:$0xf]  ;;  %v3625_v20 = vor.u32 %v4055_v11, %v3622_v12  ;;  %v4080_v11 = vld [vmem:[#allocation6 + $0x650] sm:$0xf0]  ;;  %v2956_v12 = vld [vmem:[#allocation6 + $0x50] sm:$0xf] }
 0x1c3   :  { %v3429_v23 = vor.u32 %v4006_v17, %v3426_v18  ;;  %v4031_v17 = vld [vmem:[#allocation6 + $0x4c8] sm:$0xf0]  ;;  %v2957_v15 = vor.u32 %v3891_v14, %v2956_v12 }
 0x1c4   :  { %2454 = vmatpush.bf16.msrb.mxu3 %v3177_v27  ;;  %2478 = vmatpush.bf16.msra.mxu1 %v3737_v29  ;;  %v3961_v27 = vld [vmem:[#allocation6 + $0x298] sm:$0xf0]  ;;  %v3796_v29 = vld [vmem:[#allocation6 + $0x6e0] sm:$0xf] }
 0x1c5   :  { %v3237_v37 = vor.u32 %v3961_v27, %v3236_v26  ;;  %v3884_v26 = vld [vmem:[#allocation6 + $0x30] sm:$0xf0]  ;;  %v4342_v27 = vld [vmem:[%s4387_s6] sm:$0xff] }
 0x1c6   :  { %2439 = vmatpush.bf16.msrb.mxu2 %v2981_v30  ;;  %2463 = vmatpush.bf16.msra.mxu0 %v3541_v34  ;;  %v4101_v30 = vld [vmem:[#allocation6 + $0x6f8] sm:$0xf0]  ;;  %v3912_v34 = vld [vmem:[#allocation6 + $0x110] sm:$0xf0]  ;;  %v2929_v32 = vor.u32 %v3884_v26, %v2928_v24 }
 0x1c7   :  { %v3797_v38 = vor.u32 %v4101_v30, %v3796_v29  ;;  %v4024_v29 = vld [vmem:[#allocation6 + $0x490] sm:$0xf0] }
 0x1c8   :  { %2455 = vmatpush.bf16.msrb.mxu3 %v3149_v43  ;;  %2479 = vmatpush.bf16.msra.mxu1 %v3709_v44  ;;  %v3041_v43 = vor.u32 %v3912_v34, %v3040_v33  ;;  %v3768_v44 = vld [vmem:[#allocation6 + $0x6a8] sm:$0xf]  ;;  %v988_v33 = vperm.slane %v4342_v27, 0 }
 0x1ca   :  { %2440 = vmatpush.bf16.msrb.mxu2 %v2953_v48  ;;  %2464 = vmatpush.bf16.msra.mxu0 %v3513_v49  ;;  %v3012_v48 = vld [vmem:[#allocation6 + $0xc0] sm:$0xf]  ;;  %v3905_v49 = vld [vmem:[#allocation6 + $0xd8] sm:$0xf0] }
 0x1cb   :  { %2456 = vmatmul.bf16.vlgmr.msrb.gmra.mxu3 %v4301_v25  ;;  %v3013_v55 = vor.u32 %v3905_v49, %v3012_v48  ;;  %v4059_v48 = vld [vmem:[#allocation6 + $0x5a8] sm:$0xf0]  ;;  %v989_v49 = vperm.slane %v4342_v27, 1 }
 0x1cc   :  { %2504 = vmatpush.bf16.msra.mxu3 %v3349_v45  ;;  %2480 = vmatpush.bf16.msra.mxu1 %v3681_v58  ;;  %v4094_v45 = vld [vmem:[#allocation6 + $0x6c0] sm:$0xf0]  ;;  %v3740_v58 = vld [vmem:[#allocation6 + $0x670] sm:$0xf] }
 0x1cd   :  { %v3769_v53 = vor.u32 %v4094_v45, %v3768_v44 }
 0x1ce   :  { %2441 = vmatpush.bf16.msrb.mxu2 %v2925_v61  ;;  %2465 = vmatpush.bf16.msra.mxu0 %v3485_v62  ;;  %v3573_v61 = vor.u32 %v4045_v51, %v3572_v50  ;;  %v4087_v62 = vld [vmem:[#allocation6 + $0x688] sm:$0xf0]  ;;  %v4334_v2 = vpop.f32.mrf.mxu3  ;;  %v3432_v50 = vld [vmem:[#allocation6 + $0x408] sm:$0xf]  ;;  %v4010_v51 = vld [vmem:[#allocation6 + $0x420] sm:$0xf0] }
 0x1cf   :  { %v3741_v4 = vor.u32 %v4087_v62, %v3740_v58  ;;  %v3404_v58 = vld [vmem:[#allocation6 + $0x3d0] sm:$0xf] }
 0x1d0   :  { %2505 = vmatpush.bf16.msra.mxu3 %v3321_v60  ;;  %2481 = vmatpush.bf16.msra.mxu1 %v3653_v7  ;;  %v3940_v7 = vld [vmem:[#allocation6 + $0x1f0] sm:$0xf0] }
 0x1d1   :  { %2442 = vmatmul.bf16.vlgmr.msrb.gmra.mxu2 %v4305_v42  ;;  %v3153_v18 = vor.u32 %v3940_v7, %v3152_v6 }
 0x1d2   :  { %2490 = vmatpush.bf16.msra.mxu2 %v3125_v1  ;;  %2466 = vmatpush.bf16.msra.mxu0 %v3457_v9  ;;  %v4038_v1 = vld [vmem:[#allocation6 + $0x500] sm:$0xf0] }
 0x1d3   :  { %v3545_v9 = vor.u32 %v4038_v1, %v3544_v59 }
 0x1d4   :  { %2506 = vmatpush.bf16.msra.mxu3 %v3293_v8  ;;  %2482 = vmatpush.bf16.msra.mxu1 %v3625_v20  ;;  %v2163_v60 = vpop.f32.mrf.mxu2  ;;  %v3712_v8 = vld [vmem:[#allocation6 + $0x638] sm:$0xf]  ;;  %v3684_v20 = vld [vmem:[#allocation6 + $0x600] sm:$0xf] }
 0x1d5   :  { %v3713_v19 = vor.u32 %v4080_v11, %v3712_v8  ;;  %v2164_v44 = vadd.f32 %v2163_v60, %v988_v33  ;;  %v4003_v60 = vld [vmem:[#allocation6 + $0x3e8] sm:$0xf0] }
 0x1d6   :  { %2491 = vmatpush.bf16.msra.mxu2 %v3097_v16  ;;  %2467 = vmatpush.bf16.msra.mxu0 %v3429_v23  ;;  %v4073_v23 = vld [vmem:[#allocation6 + $0x618] sm:$0xf0]  ;;  %v2179_v34 = vpop.f32.mrf.mxu3  ;;  %v3405_v59 = vor.u32 %v4003_v60, %v3404_v58 }
 0x1d7   :  { %v3685_v31 = vor.u32 %v4073_v23, %v3684_v20 }
 0x1d8   :  { %2507 = vmatpush.bf16.msra.mxu3 %v3265_v22  ;;  %2483 = vmatpush.bf16.msra.mxu1 %v3597_v35  ;;  %v4336_v16 = vpop.f32.mrf.mxu1  ;;  %v3517_v22 = vor.u32 %v4031_v17, %v3516_v10 }
 0x1da   :  { %2492 = vmatpush.bf16.msra.mxu2 %v3069_v28  ;;  %2468 = vmatpush.bf16.msra.mxu0 %v3401_v41  ;;  %v3488_v28 = vld [vmem:[#allocation6 + $0x478] sm:$0xf] }
 0x1db   :  { %2484 = vmatmul.bf16.vlgmr.msra.gmra.mxu1 %v4309_v13  ;;  %v3489_v35 = vor.u32 %v4024_v29, %v3488_v28 }
 0x1dc   :  { %2508 = vmatpush.bf16.msra.mxu3 %v3237_v37  ;;  %2532 = vmatpush.bf16.msrb.mxu1 %v3797_v38  ;;  %v2165_v21 = vpop.f32.mrf.mxu2  ;;  %v3656_v37 = vld [vmem:[#allocation6 + $0x5c8] sm:$0xf]  ;;  %v4066_v38 = vld [vmem:[#allocation6 + $0x5e0] sm:$0xf0] }
 0x1dd   :  { %v2166_v0 = vadd.f32 %v2165_v21, %v988_v33 }
 0x1de   :  { %2493 = vmatpush.bf16.msra.mxu2 %v3041_v43  ;;  %2469 = vmatpush.bf16.msra.mxu0 %v3373_v54  ;;  %v2191_v30 = vpop.f32.mrf.mxu0  ;;  %v3657_v43 = vor.u32 %v4066_v38, %v3656_v37  ;;  %v3433_v54 = vor.u32 %v4010_v51, %v3432_v50  ;;  %v2233_v62 = vpop.f32.mrf.mxu3  ;;  %v991_v38 = vperm.slane %v4342_v27, 3 }
 0x1df   :  { %v2180_v8 = vadd.f32 %v2179_v34, %v2166_v0 }
 0x1e0   :  { %2509 = vmatpush.bf16.msra.mxu3 %v3209_v52  ;;  %2533 = vmatpush.bf16.msrb.mxu1 %v3769_v53  ;;  %v2207_v41 = vpop.f32.mrf.mxu1  ;;  %v2178_v53 = vadd.f32 %v4334_v2, %v2164_v44 }
 0x1e1   :  { %2470 = vmatmul.bf16.vlgmr.msra.gmra.mxu0 %v4313_v36 }
 0x1e2   :  { %2494 = vmatpush.bf16.msra.mxu2 %v3013_v55  ;;  %2518 = vmatpush.bf16.msrb.mxu0 %v3573_v61  ;;  %v3600_v55 = vld [vmem:[#allocation6 + $0x558] sm:$0xf]  ;;  %v2192_v61 = vadd.f32 %v2191_v30, %v2178_v53 }
 0x1e3   :  { %v3601_v63 = vor.u32 %v4052_v56, %v3600_v55 }
 0x1e4   :  { %2510 = vmatpush.bf16.msra.mxu3 %v3181_v3  ;;  %2534 = vmatpush.bf16.msrb.mxu1 %v3741_v4  ;;  %v2219_v45 = vpop.f32.mrf.mxu2  ;;  %v3376_v3 = vld [vmem:[#allocation6 + $0x398] sm:$0xf]  ;;  %v3996_v4 = vld [vmem:[#allocation6 + $0x3b0] sm:$0xf0]  ;;  %v2206_v2 = vadd.f32 %v4336_v16, %v2192_v61 }
 0x1e5   :  { %v2220_v57 = vadd.f32 %v2219_v45, %v989_v49 }
 0x1e6   :  { %2495 = vmatpush.bf16.msra.mxu2 %v2985_v5  ;;  %2519 = vmatpush.bf16.msrb.mxu0 %v3545_v9  ;;  %v2193_v52 = vpop.f32.mrf.mxu0  ;;  %v3377_v9 = vor.u32 %v3996_v4, %v3376_v3  ;;  %4111 = vtanh.f32 %v2206_v2  ;;  %v2235_v10 = vpop.f32.mrf.mxu3 }
 0x1e7   :  { %v2234_v1 = vadd.f32 %v2233_v62, %v2220_v57  ;;  %v2194_v14 = vadd.f32 %v2193_v52, %v2180_v8  ;;  %v992_v8 = vperm.slane %v4342_v27, 4 }
 0x1e8   :  { %2511 = vmatpush.bf16.msra.mxu3 %v3153_v18  ;;  %2535 = vmatpush.bf16.msrb.mxu1 %v3713_v19 }
 0x1e9   :  { %v2208_v18 = vadd.f32 %v2207_v41, %v2194_v14 }
 0x1ea   :  { %2496 = vmatpush.bf16.msra.mxu2 %v2957_v15  ;;  %2520 = vmatpush.bf16.msrb.mxu0 %v3517_v22 }
 0x1eb   :  { %2512 = vmatmul.bf16.vlgmr.msra.gmra.mxu3 %v4301_v25  ;;  %v3629_v25 = vor.u32 %v4059_v48, %v3628_v47 }
 0x1ec   :  { %2536 = vmatpush.bf16.msrb.mxu1 %v3685_v31  ;;  %v2221_v5 = vpop.f32.mrf.mxu2  ;;  %v4112_v15 = vpop.eup %4111 }
 0x1ed   :  { %v2222_v11 = vadd.f32 %v2221_v5, %v989_v49 }
 0x1ee   :  { %2497 = vmatpush.bf16.msra.mxu2 %v2929_v32  ;;  %2521 = vmatpush.bf16.msrb.mxu0 %v3489_v35  ;;  %v2247_v6 = vpop.f32.mrf.mxu0  ;;  %v990_v32 = vperm.slane %v4342_v27, 2 }
 0x1ef   :  { %v2248_v7 = vadd.f32 %v2247_v6, %v2234_v1  ;;  %v2236_v17 = vadd.f32 %v2235_v10, %v2222_v11  ;;  %v993_v10 = vperm.slane %v4342_v27, 5 }
 0x1f0   :  { %2537 = vmatpush.bf16.msrb.mxu1 %v3657_v43 }
 0x1f1   :  { %2498 = vmatmul.bf16.vlgmr.msra.gmra.mxu2 %v4305_v42  ;;  %v2261_v42 = vpop.f32.mrf.mxu1 }
 0x1f2   :  { %2522 = vmatpush.bf16.msrb.mxu0 %v3461_v46  ;;  %v2262_v12 = vadd.f32 %v2261_v42, %v2248_v7 }
 0x1f4   :  { %2538 = vmatpush.bf16.msrb.mxu1 %v3629_v25  ;;  %4113 = vtanh.f32 %v2262_v12 }
 0x1f5   :  { %4115 = vtanh.f32 %v2208_v18 }
 0x1f6   :  { %2523 = vmatpush.bf16.msrb.mxu0 %v3433_v54  ;;  %v2249_v19 = vpop.f32.mrf.mxu0 }
 0x1f7   :  { %v2250_v16 = vadd.f32 %v2249_v19, %v2236_v17 }
 0x1f8   :  { %2539 = vmatpush.bf16.msrb.mxu1 %v3601_v63 }
 0x1f9   :  { %v2263_v20 = vpop.f32.mrf.mxu1 }
 0x1fa   :  { %2524 = vmatpush.bf16.msrb.mxu0 %v3405_v59  ;;  %v4114_v21 = vpop.eup %4113  ;;  %v2264_v22 = vadd.f32 %v2263_v20, %v2250_v16 }
 0x1fb   :  { %2540 = vmatmul.bf16.vlgmr.msrb.gmra.mxu1 %v4309_v13  ;;  %v2560_v23 = vpack.c.bf16 %v4114_v21, %v4112_v15  ;;  %v2275_v13 = vpop.f32.mrf.mxu2  ;;  %v4116_v24 = vpop.eup %4115 }
 0x1fc   :  { %4117 = vtanh.f32 %v2264_v22  ;;  %v2276_v34 = vadd.f32 %v2275_v13, %v990_v32 }
 0x1fd   :  { %2568 = vst [vmem:[%s4388_s7] sm:$0xff] %v2560_v23 }
 0x1fe   :  { %2525 = vmatpush.bf16.msrb.mxu0 %v3377_v9  ;;  %v2303_v31 = vpop.f32.mrf.mxu0 }
 0x201   :  { %2526 = vmatmul.bf16.vlgmr.msrb.gmra.mxu0 %v4313_v36  ;;  %v2289_v36 = vpop.f32.mrf.mxu3  ;;  %v2317_v29 = vpop.f32.mrf.mxu1 }
 0x202   :  { %v4118_v26 = vpop.eup %4117  ;;  %v2290_v40 = vadd.f32 %v2289_v36, %v2276_v34 }
 0x203   :  { %v2564_v28 = vpack.c.bf16 %v4118_v26, %v4116_v24  ;;  %v2277_v30 = vpop.f32.mrf.mxu2 }
 0x204   :  { %v2304_v43 = vadd.f32 %v2303_v31, %v2290_v40  ;;  %v2278_v45 = vadd.f32 %v2277_v30, %v990_v32 }
 0x205   :  { %2572 = vst [vmem:[%s4388_s7 + $0x1c] sm:$0xff] %v2564_v28 }
 0x206   :  { %v2305_v39 = vpop.f32.mrf.mxu0  ;;  %v2318_v48 = vadd.f32 %v2317_v29, %v2304_v43 }
 0x208   :  { %4119 = vtanh.f32 %v2318_v48 }
 0x209   :  { %v2291_v33 = vpop.f32.mrf.mxu3  ;;  %v2319_v37 = vpop.f32.mrf.mxu1 }
 0x20a   :  { %v2292_v52 = vadd.f32 %v2291_v33, %v2278_v45 }
 0x20c   :  { %v2306_v54 = vadd.f32 %v2305_v39, %v2292_v52 }
 0x20e   :  { %v2320_v57 = vadd.f32 %v2319_v37, %v2306_v54  ;;  %v4120_v61 = vpop.eup %4119 }
 0x211   :  { %v2345_v44 = vpop.f32.mrf.mxu3 }
 0x214   :  { %v2331_v35 = vpop.f32.mrf.mxu2 }
 0x215   :  { %v2332_v41 = vadd.f32 %v2331_v35, %v991_v38 }
 0x217   :  { %v2346_v47 = vadd.f32 %v2345_v44, %v2332_v41 }
 0x218   :  { %v2373_v46 = vpop.f32.mrf.mxu1 }
 0x219   :  { %v2347_v55 = vpop.f32.mrf.mxu3 }
 0x21c   :  { %v2333_v49 = vpop.f32.mrf.mxu2 }
 0x21d   :  { %v2334_v25 = vadd.f32 %v2333_v49, %v991_v38 }
 0x21e   :  { %v2359_v50 = vpop.f32.mrf.mxu0 }
 0x21f   :  { %v2360_v51 = vadd.f32 %v2359_v50, %v2346_v47  ;;  %v2348_v56 = vadd.f32 %v2347_v55, %v2334_v25  ;;  %v994_v47 = vperm.slane %v4342_v27, 6 }
 0x220   :  { %v2375_v62 = vpop.f32.mrf.mxu1 }
 0x221   :  { %v2374_v53 = vadd.f32 %v2373_v46, %v2360_v51 }
 0x223   :  { %4121 = vtanh.f32 %v2374_v53 }
 0x224   :  { %4123 = vtanh.f32 %v2320_v57 }
 0x226   :  { %v2361_v58 = vpop.f32.mrf.mxu0 }
 0x227   :  { %v2362_v60 = vadd.f32 %v2361_v58, %v2348_v56 }
 0x229   :  { %v4122_v63 = vpop.eup %4121  ;;  %v2376_v0 = vadd.f32 %v2375_v62, %v2362_v60 }
 0x22a   :  { %v2561_v59 = vpack.c.bf16 %v4122_v63, %v4120_v61  ;;  %v4124_v42 = vpop.eup %4123 }
 0x22b   :  { %4125 = vtanh.f32 %v2376_v0 }
 0x22c   :  { %2569 = vst [vmem:[%s4388_s7 + $0x8] sm:$0xff] %v2561_v59 }
 0x22e   :  { %v2401_v2 = vpop.f32.mrf.mxu3 }
 0x231   :  { %v4126_v1 = vpop.eup %4125 }
 0x232   :  { %v2565_v3 = vpack.c.bf16 %v4126_v1, %v4124_v42 }
 0x234   :  { %2573 = vst [vmem:[%s4388_s7 + $0x24] sm:$0xff] %v2565_v3  ;;  %v2387_v4 = vpop.f32.mrf.mxu2 }
 0x235   :  { %v2388_v11 = vadd.f32 %v2387_v4, %v992_v8 }
 0x236   :  { %v2403_v9 = vpop.f32.mrf.mxu3 }
 0x237   :  { %v2402_v18 = vadd.f32 %v2401_v2, %v2388_v11 }
 0x238   :  { %v2429_v5 = vpop.f32.mrf.mxu1 }
 0x23c   :  { %v2389_v6 = vpop.f32.mrf.mxu2 }
 0x23d   :  { %v2390_v20 = vadd.f32 %v2389_v6, %v992_v8 }
 0x23e   :  { %v2415_v7 = vpop.f32.mrf.mxu0 }
 0x23f   :  { %v2416_v16 = vadd.f32 %v2415_v7, %v2402_v18  ;;  %v2404_v28 = vadd.f32 %v2403_v9, %v2390_v20 }
 0x240   :  { %v2431_v14 = vpop.f32.mrf.mxu1 }
 0x241   :  { %v2430_v23 = vadd.f32 %v2429_v5, %v2416_v16 }
 0x243   :  { %4127 = vtanh.f32 %v2430_v23 }
 0x246   :  { %v2417_v17 = vpop.f32.mrf.mxu0 }
 0x247   :  { %v2418_v30 = vadd.f32 %v2417_v17, %v2404_v28 }
 0x249   :  { %v2432_v33 = vadd.f32 %v2431_v14, %v2418_v30  ;;  %v4128_v37 = vpop.eup %4127 }
 0x24e   :  { %v2457_v15 = vpop.f32.mrf.mxu3 }
 0x254   :  { %v2443_v12 = vpop.f32.mrf.mxu2 }
 0x255   :  { %v2444_v19 = vadd.f32 %v2443_v12, %v993_v10 }
 0x256   :  { %v2459_v31 = vpop.f32.mrf.mxu3 }
 0x257   :  { %v2458_v22 = vadd.f32 %v2457_v15, %v2444_v19 }
 0x258   :  { %v2485_v21 = vpop.f32.mrf.mxu1 }
 0x25c   :  { %v2445_v13 = vpop.f32.mrf.mxu2 }
 0x25d   :  { %v2446_v36 = vadd.f32 %v2445_v13, %v993_v10 }
 0x25e   :  { %v2471_v24 = vpop.f32.mrf.mxu0 }
 0x25f   :  { %v2472_v26 = vadd.f32 %v2471_v24, %v2458_v22  ;;  %v2460_v32 = vadd.f32 %v2459_v31, %v2446_v36 }
 0x260   :  { %v2487_v38 = vpop.f32.mrf.mxu1 }
 0x261   :  { %v2486_v29 = vadd.f32 %v2485_v21, %v2472_v26 }
 0x263   :  { %4129 = vtanh.f32 %v2486_v29 }
 0x264   :  { %4131 = vtanh.f32 %v2432_v33 }
 0x266   :  { %v2473_v34 = vpop.f32.mrf.mxu0 }
 0x267   :  { %v2474_v35 = vadd.f32 %v2473_v34, %v2460_v32 }
 0x269   :  { %v4130_v39 = vpop.eup %4129  ;;  %v2488_v40 = vadd.f32 %v2487_v38, %v2474_v35 }
 0x26a   :  { %v2562_v41 = vpack.c.bf16 %v4130_v39, %v4128_v37  ;;  %v4132_v43 = vpop.eup %4131 }
 0x26b   :  { %4133 = vtanh.f32 %v2488_v40 }
 0x26c   :  { %2570 = vst [vmem:[%s4388_s7 + $0x10] sm:$0xff] %v2562_v41 }
 0x26e   :  { %v2513_v49 = vpop.f32.mrf.mxu3 }
 0x271   :  { %v4134_v44 = vpop.eup %4133 }
 0x272   :  { %v2566_v46 = vpack.c.bf16 %v4134_v44, %v4132_v43 }
 0x274   :  { %v2499_v45 = vpop.f32.mrf.mxu2  ;;  %2574 = vst [vmem:[%s4388_s7 + $0x2c] sm:$0xff] %v2566_v46 }
 0x275   :  { %v2500_v48 = vadd.f32 %v2499_v45, %v994_v47 }
 0x276   :  { %v2515_v56 = vpop.f32.mrf.mxu3 }
 0x277   :  { %v2514_v51 = vadd.f32 %v2513_v49, %v2500_v48 }
 0x278   :  { %v2541_v50 = vpop.f32.mrf.mxu1 }
 0x27c   :  { %v2501_v52 = vpop.f32.mrf.mxu2 }
 0x27d   :  { %v2502_v54 = vadd.f32 %v2501_v52, %v994_v47 }
 0x27e   :  { %v2527_v25 = vpop.f32.mrf.mxu0 }
 0x27f   :  { %v2528_v53 = vadd.f32 %v2527_v25, %v2514_v51  ;;  %v2516_v57 = vadd.f32 %v2515_v56, %v2502_v54 }
 0x280   :  { %v2543_v61 = vpop.f32.mrf.mxu1 }
 0x281   :  { %v2542_v55 = vadd.f32 %v2541_v50, %v2528_v53 }
 0x283   :  { %4135 = vtanh.f32 %v2542_v55 }
 0x286   :  { %v2529_v58 = vpop.f32.mrf.mxu0 }
 0x287   :  { %v2530_v60 = vadd.f32 %v2529_v58, %v2516_v57 }
 0x289   :  { %v4136_v27 = vpop.eup %4135  ;;  %v2544_v62 = vadd.f32 %v2543_v61, %v2530_v60 }
 0x28a   :  { %v2563_v63 = vpack.c.bf16 %v4136_v27, %v4136_v27 }
 0x28b   :  { %4137 = vtanh.f32 %v2544_v62 }
 0x28c   :  { %2571 = vst [vmem:[%s4388_s7 + $0x18] sm:$0xf] %v2563_v63 }
 0x291   :  { %v4138_v0 = vpop.eup %4137 }
 0x292   :  { %v2567_v59 = vpack.c.bf16 %v4138_v0, %v4138_v0 }
 0x294   :  { %2575 = vst [vmem:[%s4388_s7 + $0x34] sm:$0xf] %v2567_v59 }
 0x295   :  { %2580 = vsyncpa [#allocation3], 1 }
 0x296   :  { %2581 = vsyncpa [#allocation5], 1 }

</bundles_post_ra>
